<compile_context>
chip_gen: v5e
topology: v5e:2x2
jax: 0.10.0
libtpu: 0.0.40
codegen_flags: <defaults>
</compile_context>

<pallas_src>
import functools
import math

import jax
import jax.numpy as jnp
from jax import lax
from jax.experimental import pallas as pl
from jax.experimental.pallas import tpu as pltpu


def _build_embedding(max_steps: int) -> jnp.ndarray:
    """Same table as DiffusionEmbedding._build_embedding (float32, [max_steps, 128])."""
    steps = jnp.arange(max_steps, dtype=jnp.float32)[:, None]          # [T, 1]
    dims = jnp.arange(64, dtype=jnp.float32)[None, :]                  # [1, 64]
    table = steps * (10.0 ** (dims * 4.0 / 63.0))                      # [T, 64]
    return jnp.concatenate([jnp.sin(table), jnp.cos(table)], axis=1)   # [T, 128]


def _fused_kernel(t_ref, table_ref, w1_ref, b1_ref, w2_ref, b2_ref, o_ref,
                  *, max_steps: int):
    # t:     [B, 1]      f32   (timesteps; int path already cast to f32)
    # table: [T_pad,128] f32   (sinusoidal table, rows padded to multiple of 8)
    # w1:    [128, 512]  bf16  (stored [in, out])
    # b1:    [1, 512]    f32
    # w2:    [512, 512]  bf16
    # b2:    [1, 512]    f32
    # o:     [B, 512]    f32
    B = t_ref.shape[0]
    T = table_ref.shape[0]

    t = t_ref[...]                                                     # [B, 1] f32
    low_f = jnp.floor(t)
    frac = t - low_f                                                   # 0 for integer t
    low_i = jnp.clip(low_f, 0.0, float(max_steps - 1)).astype(jnp.int32)
    high_i = jnp.clip(jnp.ceil(t), 0.0, float(max_steps - 1)).astype(jnp.int32)

    # Two-hot selection matrix: row b has (1-frac) at low_i[b], frac at high_i[b].
    # For integer t (low == high) the weights sum to 1 -> exact row gather.
    row = lax.broadcasted_iota(jnp.int32, (B, T), 1)                   # [B, T]
    sel = (jnp.where(row == low_i, 1.0 - frac, 0.0)
           + jnp.where(row == high_i, frac, 0.0))                      # [B, T] f32

    # Fused gather / lerp on the MXU (tiny matmul, kept in f32).
    x = jnp.dot(sel, table_ref[...], preferred_element_type=jnp.float32)   # [B, 128]

    # Linear(128->512) + SiLU  (bf16 operands, f32 accumulate, f32 elementwise).
    h = jnp.dot(x.astype(jnp.bfloat16), w1_ref[...],
                preferred_element_type=jnp.float32) + b1_ref[...]
    h = h * jax.nn.sigmoid(h)

    # Linear(512->512) + SiLU.
    y = jnp.dot(h.astype(jnp.bfloat16), w2_ref[...],
                preferred_element_type=jnp.float32) + b2_ref[...]
    o_ref[...] = y * jax.nn.sigmoid(y)


def diffusion_embedding_forward(t, table_padded, max_steps, w1, b1, w2, b2):
    """Fused (gather/lerp -> Linear -> SiLU -> Linear -> SiLU) in one pallas_call."""
    t_f = jnp.asarray(t).astype(jnp.float32).reshape(-1, 1)            # [B, 1]
    B = t_f.shape[0]
    B_pad = max(8, ((B + 7) // 8) * 8)                                 # f32 sublane multiple
    if B_pad != B:
        t_f = jnp.pad(t_f, ((0, B_pad - B), (0, 0)))

    kernel = functools.partial(_fused_kernel, max_steps=max_steps)
    vmem_spec = pl.BlockSpec(memory_space=pltpu.MemorySpace.VMEM)

    out = pl.pallas_call(
        kernel,
        out_shape=jax.ShapeDtypeStruct((B_pad, 512), jnp.float32),
        in_specs=[vmem_spec] * 6,          # whole arrays in VMEM, no grid / no pipelining
        out_specs=vmem_spec,
    )(t_f, table_padded, w1, b1, w2, b2)
    return out[:B]


class DiffusionEmbeddingPallas:
    def __init__(self, max_steps: int, key: jax.Array):
        self.max_steps = max_steps
        self.embedding = _build_embedding(max_steps)                   # [T, 128] f32
        # Pad table rows to a multiple of 8 (sublane) with zero rows; padded rows
        # are never selected (indices are clamped to max_steps-1 in-kernel).
        t_pad = ((max_steps + 7) // 8) * 8
        self.table_padded = jnp.pad(self.embedding, ((0, t_pad - max_steps), (0, 0)))

        k1, k2, k3, k4 = jax.random.split(key, 4)
        bound1 = 1.0 / math.sqrt(128.0)
        bound2 = 1.0 / math.sqrt(512.0)
        # Weights stored as [in, out] (y = x @ W + b), bf16 for the MXU.
        self.w1 = jax.random.uniform(k1, (128, 512), jnp.float32, -bound1, bound1).astype(jnp.bfloat16)
        self.b1 = jax.random.uniform(k2, (1, 512), jnp.float32, -bound1, bound1)
        self.w2 = jax.random.uniform(k3, (512, 512), jnp.float32, -bound2, bound2).astype(jnp.bfloat16)
        self.b2 = jax.random.uniform(k4, (1, 512), jnp.float32, -bound2, bound2)

    def __call__(self, t):
        # int vs float dispatch is host-side; inside the kernel both paths are the
        # same two-hot lerp (frac == 0 for integer timesteps -> exact gather).
        return diffusion_embedding_forward(
            t, self.table_padded, self.max_steps,
            self.w1, self.b1, self.w2, self.b2)


def _reference_forward(model: DiffusionEmbeddingPallas, t):
    """Pure-JAX reference (f32 everywhere, same bf16-quantized weight values)."""
    emb = model.embedding
    if jnp.issubdtype(t.dtype, jnp.integer):
        x = emb[t]
    else:
        low_idx = jnp.floor(t).astype(jnp.int32)
        high_idx = jnp.ceil(t).astype(jnp.int32)
        low = emb[low_idx]
        high = emb[high_idx]
        x = low + (high - low) * (t - low_idx.astype(t.dtype))[..., None]
    w1 = model.w1.astype(jnp.float32)
    w2 = model.w2.astype(jnp.float32)
    h = x @ w1 + model.b1
    h = h * jax.nn.sigmoid(h)
    y = h @ w2 + model.b2
    return y * jax.nn.sigmoid(y)


if __name__ == "__main__":
    key = jax.random.PRNGKey(0)
    model_key, ti_key, tf_key = jax.random.split(key, 3)

    max_steps = 50
    batch = 8
    model = DiffusionEmbeddingPallas(max_steps, model_key)

    # Integer diffusion timesteps (forward's int path).
    t_int = jax.random.randint(ti_key, (batch,), 0, max_steps, dtype=jnp.int32)
    out_int = jax.block_until_ready(model(t_int))
    ref_int = jax.block_until_ready(_reference_forward(model, t_int))
    assert out_int.shape == (batch, 512)
    assert jnp.allclose(out_int, ref_int, atol=1e-2, rtol=1e-2), (
        float(jnp.max(jnp.abs(out_int - ref_int))))

    # Fractional timesteps (forward's lerp path).
    t_flt = jax.random.uniform(tf_key, (batch,), jnp.float32, 0.0, float(max_steps - 1))
    out_flt = jax.block_until_ready(model(t_flt))
    ref_flt = jax.block_until_ready(_reference_forward(model, t_flt))
    assert out_flt.shape == (batch, 512)
    assert jnp.allclose(out_flt, ref_flt, atol=1e-2, rtol=1e-2), (
        float(jnp.max(jnp.abs(out_flt - ref_flt))))

    print("KERNEL_OK")
</pallas_src>

<mosaic_0001>
module attributes {stable_mosaic.version = 11 : i64} {
  func.func @_fused_kernel(%arg0: memref<8x1xf32, #tpu.memory_space<vmem>>, %arg1: memref<56x128xf32, #tpu.memory_space<vmem>>, %arg2: memref<128x512xbf16, #tpu.memory_space<vmem>>, %arg3: memref<1x512xf32, #tpu.memory_space<vmem>>, %arg4: memref<512x512xbf16, #tpu.memory_space<vmem>>, %arg5: memref<1x512xf32, #tpu.memory_space<vmem>>, %arg6: memref<8x512xf32, #tpu.memory_space<vmem>>) attributes {dimension_semantics = [], scalar_prefetch = 0 : i64, scratch_operands = 0 : i64, tpu.core_type = #tpu.core_type<tc>} {
    %c0 = arith.constant 0 : index
    %c0_0 = arith.constant 0 : index
    %0 = vector.load %arg0[%c0, %c0_0] : memref<8x1xf32, #tpu.memory_space<vmem>>, vector<8x1xf32>
    %1 = math.floor %0 : vector<8x1xf32>
    %2 = arith.subf %0, %1 : vector<8x1xf32>
    %cst = arith.constant 0.000000e+00 : f32
    %cst_1 = arith.constant 4.900000e+01 : f32
    %3 = vector.broadcast %cst : f32 to vector<8x1xf32>
    %4 = arith.maximumf %3, %1 : vector<8x1xf32>
    %5 = vector.broadcast %cst_1 : f32 to vector<8x1xf32>
    %6 = arith.minimumf %5, %4 : vector<8x1xf32>
    %7 = arith.fptosi %6 : vector<8x1xf32> to vector<8x1xi32>
    %8 = math.ceil %0 : vector<8x1xf32>
    %cst_2 = arith.constant 0.000000e+00 : f32
    %cst_3 = arith.constant 4.900000e+01 : f32
    %9 = vector.broadcast %cst_2 : f32 to vector<8x1xf32>
    %10 = arith.maximumf %9, %8 : vector<8x1xf32>
    %11 = vector.broadcast %cst_3 : f32 to vector<8x1xf32>
    %12 = arith.minimumf %11, %10 : vector<8x1xf32>
    %13 = arith.fptosi %12 : vector<8x1xf32> to vector<8x1xi32>
    %14 = tpu.iota {dimensions = array<i32: 1>} : vector<8x56xi32>
    %15 = vector.broadcast %7 : vector<8x1xi32> to vector<8x56xi32>
    %16 = arith.cmpi eq, %14, %15 : vector<8x56xi32>
    %cst_4 = arith.constant 1.000000e+00 : f32
    %17 = vector.broadcast %cst_4 : f32 to vector<8x1xf32>
    %18 = arith.subf %17, %2 : vector<8x1xf32>
    %cst_5 = arith.constant 0.000000e+00 : f32
    %19 = vector.shape_cast %18 : vector<8x1xf32> to vector<8x1xf32>
    %20 = vector.broadcast %19 : vector<8x1xf32> to vector<8x56xf32>
    %21 = vector.broadcast %cst_5 : f32 to vector<8x56xf32>
    %22 = arith.select %16, %20, %21 : vector<8x56xi1>, vector<8x56xf32>
    %23 = vector.broadcast %13 : vector<8x1xi32> to vector<8x56xi32>
    %24 = arith.cmpi eq, %14, %23 : vector<8x56xi32>
    %cst_6 = arith.constant 0.000000e+00 : f32
    %25 = vector.shape_cast %2 : vector<8x1xf32> to vector<8x1xf32>
    %26 = vector.broadcast %25 : vector<8x1xf32> to vector<8x56xf32>
    %27 = vector.broadcast %cst_6 : f32 to vector<8x56xf32>
    %28 = arith.select %24, %26, %27 : vector<8x56xi1>, vector<8x56xf32>
    %29 = arith.addf %22, %28 : vector<8x56xf32>
    %c0_7 = arith.constant 0 : index
    %c0_8 = arith.constant 0 : index
    %30 = vector.load %arg1[%c0_7, %c0_8] : memref<56x128xf32, #tpu.memory_space<vmem>>, vector<56x128xf32>
    %cst_9 = arith.constant dense<0.000000e+00> : vector<8x128xf32>
    %31 = tpu.matmul %29, %30, %cst_9 {dimension_numbers = #tpu.dot_dimension_numbers<[1], [0], [0], [1], [0, 0, 1, 1], [], []>} : vector<8x56xf32>, vector<56x128xf32>, vector<8x128xf32> -> vector<8x128xf32>
    %32 = arith.truncf %31 : vector<8x128xf32> to vector<8x128xbf16>
    %c0_10 = arith.constant 0 : index
    %c0_11 = arith.constant 0 : index
    %33 = vector.load %arg2[%c0_10, %c0_11] : memref<128x512xbf16, #tpu.memory_space<vmem>>, vector<128x512xbf16>
    %cst_12 = arith.constant dense<0.000000e+00> : vector<8x512xf32>
    %34 = tpu.matmul %32, %33, %cst_12 {dimension_numbers = #tpu.dot_dimension_numbers<[1], [0], [0], [1], [0, 0, 1, 1], [], []>} : vector<8x128xbf16>, vector<128x512xbf16>, vector<8x512xf32> -> vector<8x512xf32>
    %c0_13 = arith.constant 0 : index
    %c0_14 = arith.constant 0 : index
    %35 = vector.load %arg3[%c0_13, %c0_14] : memref<1x512xf32, #tpu.memory_space<vmem>>, vector<1x512xf32>
    %36 = vector.broadcast %35 : vector<1x512xf32> to vector<8x512xf32>
    %37 = arith.addf %34, %36 : vector<8x512xf32>
    %38 = arith.negf %37 : vector<8x512xf32>
    %39 = math.exp %38 : vector<8x512xf32>
    %cst_15 = arith.constant 1.000000e+00 : f32
    %40 = vector.broadcast %cst_15 : f32 to vector<8x512xf32>
    %41 = arith.addf %40, %39 : vector<8x512xf32>
    %42 = arith.divf %40, %41 : vector<8x512xf32>
    %43 = arith.mulf %37, %42 : vector<8x512xf32>
    %44 = arith.truncf %43 : vector<8x512xf32> to vector<8x512xbf16>
    %c0_16 = arith.constant 0 : index
    %c0_17 = arith.constant 0 : index
    %45 = vector.load %arg4[%c0_16, %c0_17] : memref<512x512xbf16, #tpu.memory_space<vmem>>, vector<512x512xbf16>
    %cst_18 = arith.constant dense<0.000000e+00> : vector<8x512xf32>
    %46 = tpu.matmul %44, %45, %cst_18 {dimension_numbers = #tpu.dot_dimension_numbers<[1], [0], [0], [1], [0, 0, 1, 1], [], []>} : vector<8x512xbf16>, vector<512x512xbf16>, vector<8x512xf32> -> vector<8x512xf32>
    %c0_19 = arith.constant 0 : index
    %c0_20 = arith.constant 0 : index
    %47 = vector.load %arg5[%c0_19, %c0_20] : memref<1x512xf32, #tpu.memory_space<vmem>>, vector<1x512xf32>
    %48 = vector.broadcast %47 : vector<1x512xf32> to vector<8x512xf32>
    %49 = arith.addf %46, %48 : vector<8x512xf32>
    %50 = arith.negf %49 : vector<8x512xf32>
    %51 = math.exp %50 : vector<8x512xf32>
    %cst_21 = arith.constant 1.000000e+00 : f32
    %52 = vector.broadcast %cst_21 : f32 to vector<8x512xf32>
    %53 = arith.addf %52, %51 : vector<8x512xf32>
    %54 = arith.divf %52, %53 : vector<8x512xf32>
    %55 = arith.mulf %49, %54 : vector<8x512xf32>
    %c0_22 = arith.constant 0 : index
    %c0_23 = arith.constant 0 : index
    %56 = vector.load %arg6[%c0_22, %c0_23] : memref<8x512xf32, #tpu.memory_space<vmem>>, vector<8x512xf32>
    tpu.vector_store %arg6[%c0_22, %c0_23], %55 {strides = array<i32>} : memref<8x512xf32, #tpu.memory_space<vmem>>, vector<8x512xf32>,
    return
  }
}

</mosaic_0001>

<bundles_post_ra>
// kernel: tpu_custom_call.1
= control target key start
LH: loop header
LB: loop body
LE: loop exit
PB: predicated region body
PF: predicated region fallthrough
CT: control target
= control target key end

     0   :  { %11 = vsyncpa [#allocation3], 0  ;;  %s2659_s0 = inlined_call_operand.vmem [shape: f32[8,1], index: 0, kind: input, shape index: {}]   ;;  %s2660_s1 = inlined_call_operand.hbm [shape: f32[56,128], index: 1, kind: input, shape index: {}]   ;;  %s2661_s2 = inlined_call_operand.hbm [shape: bf16[128,512], index: 2, kind: input, shape index: {}]   ;;  %s2662_s3 = inlined_call_operand.vmem [shape: f32[1,512], index: 3, kind: input, shape index: {}]   ;;  %s2663_s4 = inlined_call_operand.hbm [shape: bf16[512,512], index: 4, kind: input, shape index: {}]   ;;  %s2664_s5 = inlined_call_operand.vmem [shape: f32[1,512], index: 5, kind: input, shape index: {}]   ;;  %s2665_s6 = inlined_call_operand.hbm [shape: f32[8,512], index: 6, kind: output, shape index: {}]  }
   0x1   :  { %12 = vsyncpa [#allocation6], 0  ;;  %s33_s23 = sshll.u32 %s2661_s2, 4  ;;  %s34_s23 = int_to_ptr.hbm [resolvable:$true] %s33_s23 }
   0x2   :  { %13 = vsyncpa [#allocation4], 0  ;;  %s2521_s24 = smov [#allocation5]   ;;  %s20_s28 = sshll.u32 %s2660_s1, 4  ;;  %s21_s28 = int_to_ptr.hbm [resolvable:$true] %s20_s28 }
   0x3   :  { %s35_s25 = sshll.u32 %s2521_s24, 4  ;;  %s2522_s29 = smov 256   ;;  %s36_s25 = int_to_ptr.vmem [resolvable:$true] %s35_s25 }
   0x4   :  { %s2523_s30 = smov 16   ;;  %s2524_s7 = smov [#allocation2]  }
   0x5   :  { %41 = dma.hbm_to_vmem [thread:$0]  %s34_s23, 4096, %s36_s25, [#allocation6], %s2522_s29, %s2522_s29, %s2523_s30  }
   0x6   :  { %s22_s8 = sshll.u32 %s2524_s7, 4  ;;  %s2525_s9 = smov 128   ;;  %s23_s8 = int_to_ptr.vmem [resolvable:$true] %s22_s8 }
   0x7   :  { %s2526_s10 = smov 8   ;;  %s48_s12 = sshll.u32 %s2663_s4, 4  ;;  %s49_s12 = int_to_ptr.hbm [resolvable:$true] %s48_s12 }
   0x8   :  { %28 = dma.hbm_to_vmem [thread:$0]  %s21_s28, 896, %s23_s8, [#allocation3], %s2525_s9, %s2525_s9, %s2526_s10  }
   0x9   :  { %s2527_s13 = smov [#allocation7]  }
   0xa   :  { %s50_s14 = sshll.u32 %s2527_s13, 4  ;;  %s51_s14 = int_to_ptr.vmem [resolvable:$true] %s50_s14 }
   0xb   :  { %56 = dma.hbm_to_vmem [thread:$0]  %s49_s12, 16384, %s51_s14, [#allocation6], %s2522_s29, %s2522_s29, %s2523_s30  }
   0xc   :  { %2515 = dma.done.wait [#allocation3], 896  }
   0xd   :  { %2516 = vsyncadd [#allocation3], 4294966400 }
   0xe   :  { %2517 = dma.done.wait [#allocation6], 20480  }
   0xf   :  { %2518 = vsyncadd [#allocation6], 4294946816  ;;  %v2528_v0 = vmov 0   ;;  %v71_v1 = vld [vmem:[%s2659_s0] sm:$0xff]  ;;  %v111_v12 = vld [vmem:[#allocation2 + $0x30] sm:$0xff]  ;;  %vm112_vm2 = vcmask 457728  }
  0x10   :  { %2386 = vset.pattern.permute.xlu1 %v2528_v0  ;;  %2385 = vset.pattern.permute.xlu0 %v2528_v0  ;;  %v72_v2 = vfloor.f32 %v71_v1  ;;  %v77_v3 = vceil.f32 %v71_v1  ;;  %v110_v13 = vld [vmem:[#allocation2 + $0x28] sm:$0xff]  ;;  %v109_v14 = vld [vmem:[#allocation2 + $0x20] sm:$0xff]  ;;  %v108_v15 = vld [vmem:[#allocation2 + $0x18] sm:$0xff]  ;;  %s1552_s20 = sshll.u32 %s2665_s6, 4  ;;  %s1553_s20 = int_to_ptr.hbm [resolvable:$true] %s1552_s20 }
  0x11   :  { %125 = vmatpush.msra.mxu0 %v111_v12  ;;  %v107_v16 = vld [vmem:[#allocation2 + $0x10] sm:$0xff]  ;;  %v106_v17 = vld [vmem:[#allocation2 + $0x8] sm:$0xff]  ;;  %v105_v18 = vld [vmem:[#allocation2] sm:$0xff] }
  0x12   :  { %v73_v4 = vsub.f32 %v71_v1, %v72_v2  ;;  %v74_v5 = vmax.f32 %v72_v2, 0.0  ;;  %v78_v8 = vmax.f32 %v77_v3, 0.0  ;;  %v1678_v19 = vld [vmem:[#allocation5 + $0xe0] sm:$0xf]  ;;  %v2242_v20 = vld [vmem:[#allocation5 + $0xec] sm:$0xf0] }
  0x13   :  { %126 = vmatpush.msra.mxu0 %v110_v13  ;;  %v2240_v21 = vld [vmem:[#allocation5 + $0xe4] sm:$0xf]  ;;  %v1679_v22 = vor.u32 %v2242_v20, %v1678_v19  ;;  %v1680_v23 = vld [vmem:[#allocation5 + $0xf0] sm:$0xf0]  ;;  %v1686_v24 = vld [vmem:[#allocation5 + $0xe8] sm:$0xf] }
  0x14   :  { %v87_v6 = vsub.f32 1.0, %v73_v4  ;;  %v75_v7 = vmin.f32 %v74_v5, 49.0  ;;  %v79_v10 = vmin.f32 %v78_v8, 49.0  ;;  %v2243_v25 = vld [vmem:[#allocation5 + $0xf4] sm:$0xf0]  ;;  %v1683_v26 = vor.u32 %v2240_v21, %v1680_v23 }
  0x15   :  { %127 = vmatpush.msra.mxu0 %v109_v14  ;;  %v1687_v27 = vor.u32 %v2243_v25, %v1686_v24  ;;  %v2241_v28 = vld [vmem:[#allocation5 + $0xec] sm:$0xf]  ;;  %v1688_v29 = vld [vmem:[#allocation5 + $0xf8] sm:$0xf0]  ;;  %v1662_v30 = vld [vmem:[#allocation5 + $0xc0] sm:$0xf]  ;;  %339 = vmatpush.bf16.msra.mxu1 %v1679_v22  ;;  %v81_v22 = vlaneseq }
  0x16   :  { %90 = vperm.xlu1 %2386, %v87_v6   ;;  %v2373_v9 = vcvt.f32.s32 %v75_v7  ;;  %v2375_v11 = vcvt.f32.s32 %v79_v10  ;;  %v1691_v31 = vor.u32 %v2241_v28, %v1688_v29  ;;  %v2238_v32 = vld [vmem:[#allocation5 + $0xcc] sm:$0xf0]  ;;  %v2236_v33 = vld [vmem:[#allocation5 + $0xc4] sm:$0xf]  ;;  %v1664_v34 = vld [vmem:[#allocation5 + $0xd0] sm:$0xf0]  ;;  %352 = vmatpush.bf16.msra.mxu2 %v1683_v26 }
  0x17   :  { %128 = vmatpush.msra.mxu0 %v108_v15  ;;  %365 = vmatpush.bf16.msra.mxu3 %v1687_v27  ;;  %v1663_v35 = vor.u32 %v2238_v32, %v1662_v30  ;;  %v1667_v36 = vor.u32 %v2236_v33, %v1664_v34  ;;  %v1670_v37 = vld [vmem:[#allocation5 + $0xc8] sm:$0xf]  ;;  %v2239_v38 = vld [vmem:[#allocation5 + $0xd4] sm:$0xf0]  ;;  %v2237_v39 = vld [vmem:[#allocation5 + $0xcc] sm:$0xf] }
  0x18   :  { %84 = vperm.xlu0 %2385, %v2373_v9   ;;  %v1671_v40 = vor.u32 %v2239_v38, %v1670_v37  ;;  %v1672_v41 = vld [vmem:[#allocation5 + $0xd8] sm:$0xf0]  ;;  %v1646_v42 = vld [vmem:[#allocation5 + $0xa0] sm:$0xf]  ;;  %v2234_v43 = vld [vmem:[#allocation5 + $0xac] sm:$0xf0] }
  0x19   :  { %129 = vmatpush.msra.mxu0 %v107_v16  ;;  %v1675_v44 = vor.u32 %v2237_v39, %v1672_v41  ;;  %v2232_v45 = vld [vmem:[#allocation5 + $0xa4] sm:$0xf]  ;;  %v1648_v46 = vld [vmem:[#allocation5 + $0xb0] sm:$0xf0]  ;;  %v1654_v47 = vld [vmem:[#allocation5 + $0xa8] sm:$0xf]  ;;  %340 = vmatpush.bf16.msra.mxu1 %v1663_v35  ;;  %v1647_v48 = vor.u32 %v2234_v43, %v1646_v42 }
  0x1a   :  { %v2235_v49 = vld [vmem:[#allocation5 + $0xb4] sm:$0xf0]  ;;  %v2233_v50 = vld [vmem:[#allocation5 + $0xac] sm:$0xf]  ;;  %v1656_v51 = vld [vmem:[#allocation5 + $0xb8] sm:$0xf0]  ;;  %353 = vmatpush.bf16.msra.mxu2 %v1667_v36  ;;  %v1651_v52 = vor.u32 %v2232_v45, %v1648_v46 }
  0x1b   :  { %130 = vmatpush.msra.mxu0 %v106_v17  ;;  %366 = vmatpush.bf16.msra.mxu3 %v1671_v40  ;;  %v1655_v53 = vor.u32 %v2235_v49, %v1654_v47  ;;  %v1630_v54 = vld [vmem:[#allocation5 + $0x80] sm:$0xf]  ;;  %v2230_v55 = vld [vmem:[#allocation5 + $0x8c] sm:$0xf0]  ;;  %v2228_v56 = vld [vmem:[#allocation5 + $0x84] sm:$0xf]  ;;  %v1659_v57 = vor.u32 %v2233_v50, %v1656_v51 }
  0x1c   :  { %v1632_v58 = vld [vmem:[#allocation5 + $0x90] sm:$0xf0]  ;;  %v1638_v59 = vld [vmem:[#allocation5 + $0x88] sm:$0xf]  ;;  %v2231_v60 = vld [vmem:[#allocation5 + $0x94] sm:$0xf0]  ;;  %v1631_v63 = vor.u32 %v2230_v55, %v1630_v54 }
  0x1d   :  { %131 = vmatpush.msra.mxu0 %v105_v18  ;;  %v2229_v61 = vld [vmem:[#allocation5 + $0x8c] sm:$0xf]  ;;  %v1640_v62 = vld [vmem:[#allocation5 + $0x98] sm:$0xf0]  ;;  %341 = vmatpush.bf16.msra.mxu1 %v1647_v48  ;;  %v1635_v0 = vor.u32 %v2228_v56, %v1632_v58  ;;  %v1639_v1 = vor.u32 %v2231_v60, %v1638_v59  ;;  %v1614_v2 = vld [vmem:[#allocation5 + $0x60] sm:$0xf] }
  0x1e   :  { %100 = vperm.xlu1 %2386, %v73_v4   ;;  %354 = vmatpush.bf16.msra.mxu2 %v1651_v52  ;;  %v2226_v3 = vld [vmem:[#allocation5 + $0x6c] sm:$0xf0]  ;;  %v2224_v4 = vld [vmem:[#allocation5 + $0x64] sm:$0xf]  ;;  %v1643_v5 = vor.u32 %v2229_v61, %v1640_v62  ;;  %v1616_v6 = vld [vmem:[#allocation5 + $0x70] sm:$0xf0] }
  0x1f   :  { %378 = vmatpush.bf16.msrb.mxu0 %v1691_v31  ;;  %367 = vmatpush.bf16.msra.mxu3 %v1655_v53  ;;  %v1622_v7 = vld [vmem:[#allocation5 + $0x68] sm:$0xf]  ;;  %v2227_v8 = vld [vmem:[#allocation5 + $0x74] sm:$0xf0]  ;;  %v2225_v9 = vld [vmem:[#allocation5 + $0x6c] sm:$0xf]  ;;  %v1619_v12 = vor.u32 %v2224_v4, %v1616_v6 }
  0x20   :  { %95 = vperm.xlu0 %2385, %v2375_v11   ;;  %v1624_v10 = vld [vmem:[#allocation5 + $0x78] sm:$0xf0]  ;;  %v1615_v11 = vor.u32 %v2226_v3, %v1614_v2  ;;  %v1623_v13 = vor.u32 %v2227_v8, %v1622_v7  ;;  %v1598_v14 = vld [vmem:[#allocation5 + $0x40] sm:$0xf]  ;;  %v2222_v15 = vld [vmem:[#allocation5 + $0x4c] sm:$0xf0] }
  0x21   :  { %342 = vmatpush.bf16.msra.mxu1 %v1631_v63  ;;  %v2220_v16 = vld [vmem:[#allocation5 + $0x44] sm:$0xf]  ;;  %v1627_v17 = vor.u32 %v2225_v9, %v1624_v10  ;;  %v1600_v18 = vld [vmem:[#allocation5 + $0x50] sm:$0xf0]  ;;  %v1606_v19 = vld [vmem:[#allocation5 + $0x48] sm:$0xf]  ;;  %v1599_v26 = vor.u32 %v2222_v15, %v1598_v14 }
  0x22   :  { %355 = vmatpush.bf16.msra.mxu2 %v1635_v0  ;;  %v2223_v20 = vld [vmem:[#allocation5 + $0x54] sm:$0xf0]  ;;  %v2221_v23 = vld [vmem:[#allocation5 + $0x4c] sm:$0xf]  ;;  %v1608_v24 = vld [vmem:[#allocation5 + $0x58] sm:$0xf0]  ;;  %v1603_v27 = vor.u32 %v2220_v16, %v1600_v18 }
  0x23   :  { %379 = vmatpush.bf16.msrb.mxu0 %v1675_v44  ;;  %368 = vmatpush.bf16.msra.mxu3 %v1639_v1  ;;  %v1607_v28 = vor.u32 %v2223_v20, %v1606_v19  ;;  %v1582_v29 = vld [vmem:[#allocation5 + $0x20] sm:$0xf]  ;;  %v2218_v30 = vld [vmem:[#allocation5 + $0x2c] sm:$0xf0]  ;;  %v2216_v31 = vld [vmem:[#allocation5 + $0x24] sm:$0xf]  ;;  %v1611_v32 = vor.u32 %v2221_v23, %v1608_v24 }
  0x24   :  { %v1584_v33 = vld [vmem:[#allocation5 + $0x30] sm:$0xf0]  ;;  %v1590_v34 = vld [vmem:[#allocation5 + $0x28] sm:$0xf]  ;;  %v2219_v35 = vld [vmem:[#allocation5 + $0x34] sm:$0xf0]  ;;  %v1583_v39 = vor.u32 %v2218_v30, %v1582_v29 }
  0x25   :  { %343 = vmatpush.bf16.msra.mxu1 %v1615_v11  ;;  %v82_v36 = vand.u32 127, %v81_v22  ;;  %v2217_v37 = vld [vmem:[#allocation5 + $0x2c] sm:$0xf]  ;;  %v1592_v38 = vld [vmem:[#allocation5 + $0x38] sm:$0xf0]  ;;  %v1587_v40 = vor.u32 %v2216_v31, %v1584_v33  ;;  %v1591_v41 = vor.u32 %v2219_v35, %v1590_v34 }
  0x26   :  { %356 = vmatpush.bf16.msra.mxu2 %v1619_v12  ;;  %v1595_v42 = vor.u32 %v2217_v37, %v1592_v38  ;;  %v1566_v48 = vld [vmem:[#allocation5] sm:$0xf]  ;;  %v2214_v49 = vld [vmem:[#allocation5 + $0xc] sm:$0xf0]  ;;  %v2212_v50 = vld [vmem:[#allocation5 + $0x4] sm:$0xf] }
  0x27   :  { %380 = vmatpush.bf16.msrb.mxu0 %v1659_v57  ;;  %369 = vmatpush.bf16.msra.mxu3 %v1623_v13  ;;  %v1567_v51 = vor.u32 %v2214_v49, %v1566_v48  ;;  %v1568_v52 = vld [vmem:[#allocation5 + $0x10] sm:$0xf0]  ;;  %v1574_v53 = vld [vmem:[#allocation5 + $0x8] sm:$0xf]  ;;  %v2215_v54 = vld [vmem:[#allocation5 + $0x14] sm:$0xf0] }
  0x28   :  { %v1571_v55 = vor.u32 %v2212_v50, %v1568_v52  ;;  %v1575_v56 = vor.u32 %v2215_v54, %v1574_v53  ;;  %v2213_v57 = vld [vmem:[#allocation5 + $0xc] sm:$0xf]  ;;  %v1576_v58 = vld [vmem:[#allocation5 + $0x18] sm:$0xf0]  ;;  %v1810_v60 = vld [vmem:[#allocation7 + $0xe0] sm:$0xf] }
  0x29   :  { %344 = vmatpush.bf16.msra.mxu1 %v1599_v26  ;;  %v1579_v59 = vor.u32 %v2213_v57, %v1576_v58  ;;  %v2274_v61 = vld [vmem:[#allocation7 + $0xec] sm:$0xf0]  ;;  %v2194_v62 = vld [vmem:[#allocation7 + $0x3e0] sm:$0xf] }
  0x2a   :  { %357 = vmatpush.bf16.msra.mxu2 %v1603_v27  ;;  %v1811_v63 = vor.u32 %v2274_v61, %v1810_v60  ;;  %v2370_v0 = vld [vmem:[#allocation7 + $0x3ec] sm:$0xf0]  ;;  %v1794_v1 = vld [vmem:[#allocation7 + $0xc0] sm:$0xf] }
  0x2b   :  { %381 = vmatpush.bf16.msrb.mxu0 %v1643_v5  ;;  %370 = vmatpush.bf16.msra.mxu3 %v1607_v28  ;;  %v2270_v2 = vld [vmem:[#allocation7 + $0xcc] sm:$0xf0]  ;;  %v2195_v3 = vor.u32 %v2370_v0, %v2194_v62  ;;  %v2178_v4 = vld [vmem:[#allocation7 + $0x3c0] sm:$0xf] }
  0x2c   :  { %v2366_v5 = vld [vmem:[#allocation7 + $0x3cc] sm:$0xf0]  ;;  %v1938_v6 = vld [vmem:[#allocation7 + $0x1e0] sm:$0xf]  ;;  %v1795_v7 = vor.u32 %v2270_v2, %v1794_v1 }
  0x2d   :  { %345 = vmatpush.bf16.msra.mxu1 %v1583_v39  ;;  %v2306_v8 = vld [vmem:[#allocation7 + $0x1ec] sm:$0xf0]  ;;  %v2066_v9 = vld [vmem:[#allocation7 + $0x2e0] sm:$0xf]  ;;  %v2179_v11 = vor.u32 %v2366_v5, %v2178_v4 }
  0x2e   :  { %358 = vmatpush.bf16.msra.mxu2 %v1587_v40  ;;  %v2338_v10 = vld [vmem:[#allocation7 + $0x2ec] sm:$0xf0]  ;;  %v1939_v12 = vor.u32 %v2306_v8, %v1938_v6  ;;  %v1778_v14 = vld [vmem:[#allocation7 + $0xa0] sm:$0xf] }
  0x2f   :  { %382 = vmatpush.bf16.msrb.mxu0 %v1627_v17  ;;  %371 = vmatpush.bf16.msra.mxu3 %v1591_v41  ;;  %v2067_v13 = vor.u32 %v2338_v10, %v2066_v9  ;;  %v2266_v15 = vld [vmem:[#allocation7 + $0xac] sm:$0xf0]  ;;  %v2162_v16 = vld [vmem:[#allocation7 + $0x3a0] sm:$0xf] }
  0x30   :  { %v2362_v17 = vld [vmem:[#allocation7 + $0x3ac] sm:$0xf0]  ;;  %v1922_v18 = vld [vmem:[#allocation7 + $0x1c0] sm:$0xf]  ;;  %v1779_v23 = vor.u32 %v2266_v15, %v1778_v14 }
  0x31   :  { %346 = vmatpush.bf16.msra.mxu1 %v1567_v51  ;;  %v2302_v19 = vld [vmem:[#allocation7 + $0x1cc] sm:$0xf0]  ;;  %v2163_v27 = vor.u32 %v2362_v17, %v2162_v16  ;;  %v1906_v28 = vld [vmem:[#allocation7 + $0x1a0] sm:$0xf] }
  0x32   :  { %359 = vmatpush.bf16.msra.mxu2 %v1571_v55  ;;  %v1923_v20 = vor.u32 %v2302_v19, %v1922_v18  ;;  %v2334_v22 = vld [vmem:[#allocation7 + $0x2cc] sm:$0xf0]  ;;  %v2034_v30 = vld [vmem:[#allocation7 + $0x2a0] sm:$0xf]  ;;  %v2272_v18 = vld [vmem:[#allocation7 + $0xe4] sm:$0xf] }
  0x33   :  { %383 = vmatpush.bf16.msrb.mxu0 %v1611_v32  ;;  %372 = vmatpush.bf16.msra.mxu3 %v1575_v56  ;;  %v2262_v26 = vld [vmem:[#allocation7 + $0x8c] sm:$0xf0]  ;;  %v2146_v31 = vld [vmem:[#allocation7 + $0x380] sm:$0xf]  ;;  %v1812_v19 = vld [vmem:[#allocation7 + $0xf0] sm:$0xf0] }
  0x34   :  { %v2298_v29 = vld [vmem:[#allocation7 + $0x1ac] sm:$0xf0]  ;;  %v2018_v39 = vld [vmem:[#allocation7 + $0x280] sm:$0xf] }
  0x35   :  { %1253 = vmatpush.bf16.msrb.mxu1 %v1811_v63  ;;  %v2358_v32 = vld [vmem:[#allocation7 + $0x38c] sm:$0xf0]  ;;  %v1907_v34 = vor.u32 %v2298_v29, %v1906_v28  ;;  %v1874_v48 = vld [vmem:[#allocation7 + $0x160] sm:$0xf] }
  0x36   :  { %1266 = vmatpush.bf16.msrb.mxu2 %v1939_v12  ;;  %v2330_v33 = vld [vmem:[#allocation7 + $0x2ac] sm:$0xf0]  ;;  %v2147_v41 = vor.u32 %v2358_v32, %v2146_v31  ;;  %v2002_v51 = vld [vmem:[#allocation7 + $0x260] sm:$0xf]  ;;  %v1796_v31 = vld [vmem:[#allocation7 + $0xd0] sm:$0xf0] }
  0x37   :  { %384 = vmatpush.bf16.msrb.mxu0 %v1595_v42  ;;  %1279 = vmatpush.bf16.msrb.mxu3 %v2067_v13  ;;  %v2035_v35 = vor.u32 %v2330_v33, %v2034_v30  ;;  %v2294_v38 = vld [vmem:[#allocation7 + $0x18c] sm:$0xf0]  ;;  %v1746_v42 = vld [vmem:[#allocation7 + $0x60] sm:$0xf]  ;;  %v2268_v30 = vld [vmem:[#allocation7 + $0xc4] sm:$0xf] }
  0x38   :  { %v2326_v40 = vld [vmem:[#allocation7 + $0x28c] sm:$0xf0]  ;;  %v1730_v54 = vld [vmem:[#allocation7 + $0x40] sm:$0xf]  ;;  %v2364_v32 = vld [vmem:[#allocation7 + $0x3c4] sm:$0xf]  ;;  %v1799_v33 = vor.u32 %v2268_v30, %v1796_v31 }
  0x39   :  { %1254 = vmatpush.bf16.msrb.mxu1 %v1795_v7  ;;  %v2290_v50 = vld [vmem:[#allocation7 + $0x16c] sm:$0xf0]  ;;  %v2114_v56 = vld [vmem:[#allocation7 + $0x340] sm:$0xf] }
  0x3a   :  { %1267 = vmatpush.bf16.msrb.mxu2 %v1923_v20  ;;  %v2322_v52 = vld [vmem:[#allocation7 + $0x26c] sm:$0xf0]  ;;  %v1875_v58 = vor.u32 %v2290_v50, %v1874_v48  ;;  %v1714_v0 = vld [vmem:[#allocation7 + $0x20] sm:$0xf]  ;;  %v1815_v20 = vor.u32 %v2272_v18, %v1812_v19  ;;  %v2264_v48 = vld [vmem:[#allocation7 + $0xa4] sm:$0xf] }
  0x3b   :  { %385 = vmatpush.bf16.msrb.mxu0 %v1579_v59  ;;  %v2254_v55 = vld [vmem:[#allocation7 + $0x4c] sm:$0xf0]  ;;  %v2003_v59 = vor.u32 %v2322_v52, %v2002_v51  ;;  %v2098_v2 = vld [vmem:[#allocation7 + $0x320] sm:$0xf]  ;;  %v2360_v50 = vld [vmem:[#allocation7 + $0x3a4] sm:$0xf] }
  0x3c   :  { %v2350_v57 = vld [vmem:[#allocation7 + $0x34c] sm:$0xf0]  ;;  %v1731_v60 = vor.u32 %v2254_v55, %v1730_v54  ;;  %v1858_v6 = vld [vmem:[#allocation7 + $0x140] sm:$0xf]  ;;  %v2164_v52 = vld [vmem:[#allocation7 + $0x3b0] sm:$0xf0] }
  0x3d   :  { %1255 = vmatpush.bf16.msrb.mxu1 %v1779_v23  ;;  %v2115_v61 = vor.u32 %v2350_v57, %v2114_v56  ;;  %v2250_v1 = vld [vmem:[#allocation7 + $0x2c] sm:$0xf0]  ;;  %v1986_v8 = vld [vmem:[#allocation7 + $0x240] sm:$0xf]  ;;  %v2300_v54 = vld [vmem:[#allocation7 + $0x1c4] sm:$0xf] }
  0x3e   :  { %1268 = vmatpush.bf16.msrb.mxu2 %v1907_v34  ;;  %v2346_v4 = vld [vmem:[#allocation7 + $0x32c] sm:$0xf0]  ;;  %v1698_v12 = vld [vmem:[#allocation7] sm:$0xf]  ;;  %v2180_v34 = vld [vmem:[#allocation7 + $0x3d0] sm:$0xf0] }
  0x3f   :  { %v2099_v5 = vor.u32 %v2346_v4, %v2098_v2  ;;  %v2286_v7 = vld [vmem:[#allocation7 + $0x14c] sm:$0xf0]  ;;  %v2082_v14 = vld [vmem:[#allocation7 + $0x300] sm:$0xf]  ;;  %v1924_v55 = vld [vmem:[#allocation7 + $0x1d0] sm:$0xf0] }
  0x40   :  { %v1859_v9 = vor.u32 %v2286_v7, %v1858_v6  ;;  %v2318_v10 = vld [vmem:[#allocation7 + $0x24c] sm:$0xf0]  ;;  %v1842_v23 = vld [vmem:[#allocation7 + $0x120] sm:$0xf]  ;;  %v2332_v56 = vld [vmem:[#allocation7 + $0x2c4] sm:$0xf]  ;;  %v1927_v57 = vor.u32 %v2300_v54, %v1924_v55 }
  0x41   :  { %v2246_v13 = vld [vmem:[#allocation7 + $0xc] sm:$0xf0]  ;;  %v2296_v2 = vld [vmem:[#allocation7 + $0x1a4] sm:$0xf]  ;;  %v2036_v6 = vld [vmem:[#allocation7 + $0x2b0] sm:$0xf0] }
  0x42   :  { %v1699_v15 = vor.u32 %v2246_v13, %v1698_v12  ;;  %v2342_v16 = vld [vmem:[#allocation7 + $0x30c] sm:$0xf0]  ;;  %v2328_v4 = vld [vmem:[#allocation7 + $0x2a4] sm:$0xf]  ;;  %v2132_v12 = vld [vmem:[#allocation7 + $0x370] sm:$0xf0] }
  0x43   :  { %v2083_v17 = vor.u32 %v2342_v16, %v2082_v14  ;;  %v2039_v7 = vor.u32 %v2328_v4, %v2036_v6  ;;  %v2292_v14 = vld [vmem:[#allocation7 + $0x184] sm:$0xf]  ;;  %v2020_v19 = vld [vmem:[#allocation7 + $0x290] sm:$0xf0] }
  0x44   :  { %v2324_v16 = vld [vmem:[#allocation7 + $0x284] sm:$0xf] }
  0x88   :  { %v91_v21 = vpop.permute.xlu1 %90 }
  0x8a   :  { %v85_v25 = vpop.permute.xlu0 %84 }
  0x8b   :  { %vm86_vm0 = vcmp.eq.s32.totalorder %v82_v36, %v85_v25  ;;  %v1762_v25 = vld [vmem:[#allocation7 + $0x80] sm:$0xf] }
  0x8c   :  { %v93_v45 = vsel %vm86_vm0, %v91_v21, 0.0  ;;  %v2050_v21 = vld [vmem:[#allocation7 + $0x2c0] sm:$0xf]  ;;  %v1763_v37 = vor.u32 %v2262_v26, %v1762_v25  ;;  %v2282_v25 = vld [vmem:[#allocation7 + $0x12c] sm:$0xf0] }
  0x8d   :  { %v2051_v24 = vor.u32 %v2334_v22, %v2050_v21  ;;  %v2368_v21 = vld [vmem:[#allocation7 + $0x3e4] sm:$0xf]  ;;  %v2196_v22 = vld [vmem:[#allocation7 + $0x3f0] sm:$0xf0]  ;;  %v1970_v26 = vld [vmem:[#allocation7 + $0x220] sm:$0xf]  ;;  %v1843_v28 = vor.u32 %v2282_v25, %v1842_v23 }
  0x8e   :  { %1256 = vmatpush.bf16.msrb.mxu1 %v1763_v37  ;;  %v2183_v37 = vor.u32 %v2364_v32, %v2180_v34  ;;  %v2348_v23 = vld [vmem:[#allocation7 + $0x344] sm:$0xf]  ;;  %v2116_v25 = vld [vmem:[#allocation7 + $0x350] sm:$0xf0] }
  0x8f   :  { %1280 = vmatpush.bf16.msrb.mxu3 %v2051_v24  ;;  %v2199_v24 = vor.u32 %v2368_v21, %v2196_v22  ;;  %v2252_v21 = vld [vmem:[#allocation7 + $0x44] sm:$0xf]  ;;  %v1732_v22 = vld [vmem:[#allocation7 + $0x50] sm:$0xf0] }
  0x90   :  { %v101_v44 = vpop.permute.xlu1 %100 }
  0x92   :  { %v96_v43 = vpop.permute.xlu0 %95 }
  0x93   :  { %vm97_vm1 = vcmp.eq.s32.totalorder %v82_v36, %v96_v43  ;;  %v1890_v36 = vld [vmem:[#allocation7 + $0x180] sm:$0xf]  ;;  %v2258_v43 = vld [vmem:[#allocation7 + $0x6c] sm:$0xf0]  ;;  %1281 = vmatpush.bf16.msrb.mxu3 %v2035_v35 }
  0x94   :  { %v103_v46 = vsel %vm97_vm1, %v101_v44, 0.0  ;;  %v2130_v44 = vld [vmem:[#allocation7 + $0x360] sm:$0xf]  ;;  %v1747_v49 = vor.u32 %v2258_v43, %v1746_v42  ;;  %v1940_v43 = vld [vmem:[#allocation7 + $0x1f0] sm:$0xf0] }
  0x95   :  { %v104_v47 = vadd.f32 %v103_v46, %v93_v45  ;;  %v2354_v45 = vld [vmem:[#allocation7 + $0x36c] sm:$0xf0]  ;;  %v1891_v46 = vor.u32 %v2294_v38, %v1890_v36  ;;  %v1826_v35 = vld [vmem:[#allocation7 + $0x100] sm:$0xf] }
  0x96   :  { %v2131_v53 = vor.u32 %v2354_v45, %v2130_v44  ;;  %1257 = vmatpush.bf16.msrb.mxu1 %v1747_v49  ;;  %v2278_v36 = vld [vmem:[#allocation7 + $0x10c] sm:$0xf0]  ;;  %v2336_v44 = vld [vmem:[#allocation7 + $0x2e4] sm:$0xf]  ;;  %v2068_v45 = vld [vmem:[#allocation7 + $0x2f0] sm:$0xf0] }
  0x97   :  { %1563 = vmatmul.msk.f32.vlgmr.msra.gmra.mxu0 %vm112_vm2, %v104_v47  ;;  %v2019_v47 = vor.u32 %v2326_v40, %v2018_v39  ;;  %1269 = vmatpush.bf16.msrb.mxu2 %v1891_v46  ;;  %v1827_v38 = vor.u32 %v2278_v36, %v1826_v35  ;;  %v1954_v39 = vld [vmem:[#allocation7 + $0x200] sm:$0xf]  ;;  %v2310_v40 = vld [vmem:[#allocation7 + $0x20c] sm:$0xf0]  ;;  %v1780_v49 = vld [vmem:[#allocation7 + $0xb0] sm:$0xf0] }
  0x98   :  { %1292 = vmatpush.bf16.msra.mxu0 %v2195_v3  ;;  %v1715_v3 = vor.u32 %v2250_v1, %v1714_v0  ;;  %v1955_v42 = vor.u32 %v2310_v40, %v1954_v39  ;;  %v1783_v51 = vor.u32 %v2264_v48, %v1780_v49  ;;  %v2148_v0 = vld [vmem:[#allocation7 + $0x390] sm:$0xf0]  ;;  %v2248_v35 = vld [vmem:[#allocation7 + $0x24] sm:$0xf] }
  0x99   :  { %1282 = vmatpush.bf16.msrb.mxu3 %v2019_v47  ;;  %v2071_v47 = vor.u32 %v2336_v44, %v2068_v45  ;;  %v1716_v36 = vld [vmem:[#allocation7 + $0x30] sm:$0xf0]  ;;  %v2316_v44 = vld [vmem:[#allocation7 + $0x244] sm:$0xf] }
  0x9a   :  { %1258 = vmatpush.bf16.msrb.mxu1 %v1731_v60  ;;  %v2260_v60 = vld [vmem:[#allocation7 + $0x84] sm:$0xf]  ;;  %v2100_v39 = vld [vmem:[#allocation7 + $0x330] sm:$0xf0] }
  0x9b   :  { %1270 = vmatpush.bf16.msrb.mxu2 %v1875_v58  ;;  %v2052_v58 = vld [vmem:[#allocation7 + $0x2d0] sm:$0xf0] }
  0x9c   :  { %1293 = vmatpush.bf16.msra.mxu0 %v2179_v11  ;;  %v1987_v11 = vor.u32 %v2318_v10, %v1986_v8  ;;  %v2256_v8 = vld [vmem:[#allocation7 + $0x64] sm:$0xf]  ;;  %v1988_v48 = vld [vmem:[#allocation7 + $0x250] sm:$0xf0] }
  0x9d   :  { %1283 = vmatpush.bf16.msrb.mxu3 %v2003_v59  ;;  %v2055_v59 = vor.u32 %v2332_v56, %v2052_v58  ;;  %v2352_v10 = vld [vmem:[#allocation7 + $0x364] sm:$0xf] }
  0x9e   :  { %1259 = vmatpush.bf16.msrb.mxu1 %v1715_v3  ;;  %v1908_v3 = vld [vmem:[#allocation7 + $0x1b0] sm:$0xf0]  ;;  %v2135_v13 = vor.u32 %v2352_v10, %v2132_v12 }
  0x9f   :  { %1271 = vmatpush.bf16.msrb.mxu2 %v1859_v9  ;;  %v1748_v9 = vld [vmem:[#allocation7 + $0x70] sm:$0xf0] }
  0xa0   :  { %1294 = vmatpush.bf16.msra.mxu0 %v2163_v27  ;;  %v2314_v27 = vld [vmem:[#allocation7 + $0x22c] sm:$0xf0] }
  0xa1   :  { %1284 = vmatpush.bf16.msrb.mxu3 %v1987_v11  ;;  %v1971_v29 = vor.u32 %v2314_v27, %v1970_v26  ;;  %v1751_v11 = vor.u32 %v2256_v8, %v1748_v9  ;;  %v2119_v26 = vor.u32 %v2348_v23, %v2116_v25  ;;  %v2288_v27 = vld [vmem:[#allocation7 + $0x164] sm:$0xf]  ;;  %v1828_v9 = vld [vmem:[#allocation7 + $0x110] sm:$0xf0] }
  0xa2   :  { %1260 = vmatpush.bf16.msrb.mxu1 %v1699_v15  ;;  %v1892_v15 = vld [vmem:[#allocation7 + $0x190] sm:$0xf0]  ;;  %v2276_v8 = vld [vmem:[#allocation7 + $0x104] sm:$0xf] }
  0xa3   :  { %1272 = vmatpush.bf16.msrb.mxu2 %v1843_v28  ;;  %v1895_v18 = vor.u32 %v2292_v14, %v1892_v15  ;;  %v1876_v28 = vld [vmem:[#allocation7 + $0x170] sm:$0xf0]  ;;  %v1831_v12 = vor.u32 %v2276_v8, %v1828_v9  ;;  %v1802_v9 = vld [vmem:[#allocation7 + $0xc8] sm:$0xf] }
  0xa4   :  { %1295 = vmatpush.bf16.msra.mxu0 %v2147_v41  ;;  %v2304_v41 = vld [vmem:[#allocation7 + $0x1e4] sm:$0xf]  ;;  %v1879_v32 = vor.u32 %v2288_v27, %v1876_v28  ;;  %v1956_v14 = vld [vmem:[#allocation7 + $0x210] sm:$0xf0] }
  0xa5   :  { %1285 = vmatpush.bf16.msrb.mxu3 %v1971_v29  ;;  %v1943_v46 = vor.u32 %v2304_v41, %v1940_v43  ;;  %v2320_v29 = vld [vmem:[#allocation7 + $0x264] sm:$0xf]  ;;  %v1860_v43 = vld [vmem:[#allocation7 + $0x150] sm:$0xf0] }
  0xa7   :  { %1273 = vmatpush.bf16.msrb.mxu2 %v1827_v38  ;;  %v1719_v38 = vor.u32 %v2248_v35, %v1716_v36 }
  0xa8   :  { %1296 = vmatpush.bf16.msra.mxu0 %v2131_v53  ;;  %v2167_v53 = vor.u32 %v2360_v50, %v2164_v52  ;;  %v1991_v50 = vor.u32 %v2316_v44, %v1988_v48  ;;  %v1700_v52 = vld [vmem:[#allocation7 + $0x10] sm:$0xf0] }
  0xa9   :  { %1286 = vmatpush.bf16.msrb.mxu3 %v1955_v42  ;;  %v2284_v42 = vld [vmem:[#allocation7 + $0x144] sm:$0xf] }
  0xac   :  { %1297 = vmatpush.bf16.msra.mxu0 %v2115_v61  ;;  %v1764_v61 = vld [vmem:[#allocation7 + $0x90] sm:$0xf0] }
  0xb0   :  { %1298 = vmatpush.bf16.msra.mxu0 %v2099_v5  ;;  %v1911_v5 = vor.u32 %v2296_v2, %v1908_v3  ;;  %v1972_v2 = vld [vmem:[#allocation7 + $0x230] sm:$0xf0] }
  0xb4   :  { %1299 = vmatpush.bf16.msra.mxu0 %v2083_v17  ;;  %v2580_v17 = vld [vmem:[%s2662_s3] sm:$0xf] }
  0xb5   :  { %v171_v30 = vperm.slane %v2580_v17, 0  ;;  %v174_v31 = vperm.slane %v2580_v17, 3  ;;  %v172_v55 = vperm.slane %v2580_v17, 1 }
 0x114   :  { %v133_v62 = vpop.f32.mrf.mxu0 }
 0x115   :  { %v136_v63 = vpack.c.bf16 %v133_v62, %v133_v62  ;;  %v2356_v62 = vld [vmem:[#allocation7 + $0x384] sm:$0xf] }
 0x116   :  { %v2151_v1 = vor.u32 %v2356_v62, %v2148_v0  ;;  %v1844_v62 = vld [vmem:[#allocation7 + $0x130] sm:$0xf0] }
 0x117   :  { %347 = vmatmul.bf16.vlgmr.msra.gmra.mxu1 %v136_v63  ;;  %360 = vmatmul.bf16.vlgmr.msra.gmra.mxu2 %v136_v63 }
 0x118   :  { %373 = vmatmul.bf16.vlgmr.msra.gmra.mxu3 %v136_v63  ;;  %386 = vmatmul.bf16.vlgmr.msrb.gmra.mxu0 %v136_v63  ;;  %v1767_v63 = vor.u32 %v2260_v60, %v1764_v61  ;;  %v2280_v61 = vld [vmem:[#allocation7 + $0x124] sm:$0xf] }
 0x119   :  { %1305 = vmatpush.bf16.msra.mxu1 %v1815_v20  ;;  %1344 = vmatpush.bf16.msrb.mxu0 %v2199_v24  ;;  %v2023_v20 = vor.u32 %v2324_v16, %v2020_v19  ;;  %v1735_v24 = vor.u32 %v2252_v21, %v1732_v22  ;;  %v1847_v0 = vor.u32 %v2280_v61, %v1844_v62  ;;  %v2371_v61 = vld [vmem:[#allocation7 + $0x3f4] sm:$0xf0] }
 0x11a   :  { %1318 = vmatpush.bf16.msra.mxu2 %v1943_v46  ;;  %1331 = vmatpush.bf16.msra.mxu3 %v2071_v47  ;;  %v1863_v47 = vor.u32 %v2284_v42, %v1860_v43 }
 0x11d   :  { %1306 = vmatpush.bf16.msra.mxu1 %v1799_v33  ;;  %1345 = vmatpush.bf16.msrb.mxu0 %v2183_v37  ;;  %v2004_v33 = vld [vmem:[#allocation7 + $0x270] sm:$0xf0]  ;;  %v2344_v37 = vld [vmem:[#allocation7 + $0x324] sm:$0xf] }
 0x11e   :  { %1319 = vmatpush.bf16.msra.mxu2 %v1927_v57  ;;  %1332 = vmatpush.bf16.msra.mxu3 %v2055_v59  ;;  %v2007_v34 = vor.u32 %v2320_v29, %v2004_v33  ;;  %v2103_v41 = vor.u32 %v2344_v37, %v2100_v39  ;;  %v2084_v57 = vld [vmem:[#allocation7 + $0x310] sm:$0xf0]  ;;  %v173_v59 = vperm.slane %v2580_v17, 2 }
 0x121   :  { %1307 = vmatpush.bf16.msra.mxu1 %v1783_v51  ;;  %1346 = vmatpush.bf16.msrb.mxu0 %v2167_v53  ;;  %v2244_v51 = vld [vmem:[#allocation7 + $0x4] sm:$0xf] }
 0x122   :  { %1320 = vmatpush.bf16.msra.mxu2 %v1911_v5  ;;  %1333 = vmatpush.bf16.msra.mxu3 %v2039_v7  ;;  %v2340_v53 = vld [vmem:[#allocation7 + $0x304] sm:$0xf]  ;;  %v1703_v56 = vor.u32 %v2244_v51, %v1700_v52 }
 0x123   :  { %v2087_v60 = vor.u32 %v2340_v53, %v2084_v57 }
 0x125   :  { %1308 = vmatpush.bf16.msra.mxu1 %v1767_v63  ;;  %1347 = vmatpush.bf16.msrb.mxu0 %v2151_v1  ;;  %v2312_v1 = vld [vmem:[#allocation7 + $0x224] sm:$0xf] }
 0x126   :  { %1321 = vmatpush.bf16.msra.mxu2 %v1895_v18  ;;  %1334 = vmatpush.bf16.msra.mxu3 %v2023_v20  ;;  %v1975_v5 = vor.u32 %v2312_v1, %v1972_v2 }
 0x129   :  { %1309 = vmatpush.bf16.msra.mxu1 %v1751_v11  ;;  %1348 = vmatpush.bf16.msrb.mxu0 %v2135_v13  ;;  %v2308_v13 = vld [vmem:[#allocation7 + $0x204] sm:$0xf] }
 0x12a   :  { %1322 = vmatpush.bf16.msra.mxu2 %v1879_v32  ;;  %1335 = vmatpush.bf16.msra.mxu3 %v2007_v34  ;;  %v1959_v16 = vor.u32 %v2308_v13, %v1956_v14  ;;  %v2606_v32 = vld [vmem:[#allocation7 + $0xf4] sm:$0xf0] }
 0x12b   :  { %v2367_v13 = vld [vmem:[#allocation7 + $0x3d4] sm:$0xf0] }
 0x12d   :  { %1310 = vmatpush.bf16.msra.mxu1 %v1735_v24  ;;  %1349 = vmatpush.bf16.msrb.mxu0 %v2119_v26 }
 0x12e   :  { %1323 = vmatpush.bf16.msra.mxu2 %v1863_v47  ;;  %1336 = vmatpush.bf16.msra.mxu3 %v1991_v50 }
 0x131   :  { %1311 = vmatpush.bf16.msra.mxu1 %v1719_v38  ;;  %1350 = vmatpush.bf16.msrb.mxu0 %v2103_v41 }
 0x132   :  { %1324 = vmatpush.bf16.msra.mxu2 %v1847_v0  ;;  %1337 = vmatpush.bf16.msra.mxu3 %v1975_v5 }
 0x135   :  { %1312 = vmatpush.bf16.msra.mxu1 %v1703_v56  ;;  %1351 = vmatpush.bf16.msrb.mxu0 %v2087_v60  ;;  %v2202_v60 = vld [vmem:[#allocation7 + $0x3e8] sm:$0xf] }
 0x136   :  { %1325 = vmatpush.bf16.msra.mxu2 %v1831_v12  ;;  %1338 = vmatpush.bf16.msra.mxu3 %v1959_v16  ;;  %v2203_v8 = vor.u32 %v2371_v61, %v2202_v60  ;;  %v1946_v16 = vld [vmem:[#allocation7 + $0x1e8] sm:$0xf]  ;;  %v2295_v60 = vld [vmem:[#allocation7 + $0x194] sm:$0xf0] }
 0x194   :  { %v348_v40 = vpop.f32.mrf.mxu1 }
 0x195   :  { %v2584_v45 = vadd.f32 %v348_v40, %v171_v30  ;;  %v387_v46 = vpop.f32.mrf.mxu0 }
 0x196   :  { %v2586_v49 = vadd.f32 %v387_v46, %v174_v31  ;;  %v2604_v31 = vld [vmem:[#allocation7 + $0xe8] sm:$0xf] }
 0x197   :  { %v1692_v54 = vmul.f32 -1.442695, %v2584_v45  ;;  %v1819_v40 = vor.u32 %v2606_v32, %v2604_v31  ;;  %v2363_v31 = vld [vmem:[#allocation7 + $0x3b4] sm:$0xf0] }
 0x198   :  { %v1695_v58 = vmul.f32 -1.442695, %v2586_v49 }
 0x199   :  { %2387 = vpow2.f32 %v1692_v54 }
 0x19a   :  { %2389 = vpow2.f32 %v1695_v58  ;;  %v361_v63 = vpop.f32.mrf.mxu2 }
 0x19b   :  { %v2592_v3 = vadd.f32 %v361_v63, %v172_v55  ;;  %v374_v4 = vpop.f32.mrf.mxu3 }
 0x19c   :  { %v2594_v6 = vadd.f32 %v374_v4, %v173_v59  ;;  %v350_v7 = vpop.f32.mrf.mxu1 }
 0x19d   :  { %v1693_v10 = vmul.f32 -1.442695, %v2592_v3  ;;  %v389_v11 = vpop.f32.mrf.mxu0 }
 0x19e   :  { %v1694_v15 = vmul.f32 -1.442695, %v2594_v6 }
 0x19f   :  { %v2388_v17 = vpop.eup %2387  ;;  %2391 = vpow2.f32 %v1693_v10  ;;  %v2271_v10 = vld [vmem:[#allocation7 + $0xd4] sm:$0xf0] }
 0x1a0   :  { %v2390_v18 = vpop.eup %2389  ;;  %v403_v19 = vadd.f32 1.0, %v2388_v17  ;;  %2393 = vpow2.f32 %v1694_v15  ;;  %v2307_v17 = vld [vmem:[#allocation7 + $0x1f4] sm:$0xf0] }
 0x1a1   :  { %v406_v20 = vadd.f32 1.0, %v2390_v18 }
 0x1a2   :  { %2395 = vrcp.f32 %v403_v19  ;;  %v363_v21 = vpop.f32.mrf.mxu2  ;;  %v416_v34 = vand.u32 2147483647, %v403_v19  ;;  %v418_v35 = vand.u32 2147483648, %v403_v19  ;;  %vm412_vm4 = vweird.f32 %v403_v19 }
 0x1a3   :  { %2397 = vrcp.f32 %v406_v20  ;;  %v376_v22 = vpop.f32.mrf.mxu3  ;;  %v461_v37 = vand.u32 2147483647, %v406_v20  ;;  %v463_v38 = vand.u32 2147483648, %v406_v20  ;;  %vm457_vm5 = vweird.f32 %v406_v20  ;;  %v2074_v21 = vld [vmem:[#allocation7 + $0x2e8] sm:$0xf] }
 0x1a4   :  { %vm417_vm7 = vcmp.eq.f32.partialorder %v416_v34, 8.507059e+37  ;;  %v419_v46 = vor.u32 1.1754944e-38, %v418_v35  ;;  %v2339_v22 = vld [vmem:[#allocation7 + $0x2f4] sm:$0xf0]  ;;  %v1930_v34 = vld [vmem:[#allocation7 + $0x1c8] sm:$0xf] }
 0x1a5   :  { %v2392_v23 = vpop.eup %2391  ;;  %vm462_vm9 = vcmp.eq.f32.partialorder %v461_v37, 8.507059e+37  ;;  %v464_v50 = vor.u32 1.1754944e-38, %v463_v38  ;;  %v2303_v35 = vld [vmem:[#allocation7 + $0x1d4] sm:$0xf0] }
 0x1a6   :  { %v2394_v24 = vpop.eup %2393  ;;  %v2598_v25 = vadd.f32 1.0, %v2392_v23  ;;  %v2335_v38 = vld [vmem:[#allocation7 + $0x2d4] sm:$0xf0] }
 0x1a7   :  { %v2600_v26 = vadd.f32 1.0, %v2394_v24 }
 0x1a8   :  { %v2396_v27 = vpop.eup %2395  ;;  %2399 = vrcp.f32 %v2598_v25  ;;  %v431_v54 = vand.u32 2147483647, %v2598_v25  ;;  %v433_v55 = vand.u32 2147483648, %v2598_v25  ;;  %vm427_vm13 = vweird.f32 %v2598_v25 }
 0x1a9   :  { %v2398_v28 = vpop.eup %2397  ;;  %v408_v29 = vmul.f32 %v2396_v27, %v403_v19  ;;  %2401 = vrcp.f32 %v2600_v26  ;;  %vm413_vm3 = vweird.f32 %v2396_v27  ;;  %v448_v59 = vand.u32 2147483648, %v2600_v26 }
 0x1aa   :  { %v453_v30 = vmul.f32 %v2398_v28, %v406_v20  ;;  %vm458_vm6 = vweird.f32 %v2398_v28  ;;  %vm414_vm8 = vmor %vm412_vm4, %vm413_vm3  ;;  %v446_v4 = vand.u32 2147483647, %v2600_v26  ;;  %vm442_vm15 = vweird.f32 %v2600_v26 }
 0x1ab   :  { %v409_v33 = vsub.f32 1.0, %v408_v29  ;;  %vm459_vm10 = vmor %vm457_vm5, %vm458_vm6  ;;  %vm432_vm0 = vcmp.eq.f32.partialorder %v431_v54, 8.507059e+37  ;;  %v449_v15 = vor.u32 1.1754944e-38, %v448_v59  ;;  %v1803_v20 = vor.u32 %v2271_v10, %v1802_v9  ;;  %v2259_v54 = vld [vmem:[#allocation7 + $0x74] sm:$0xf0] }
 0x1ac   :  { %v454_v36 = vsub.f32 1.0, %v453_v30  ;;  %vm447_vm2 = vcmp.eq.f32.partialorder %v446_v4, 8.507059e+37  ;;  %v1947_v29 = vor.u32 %v2307_v17, %v1946_v16  ;;  %v2170_v30 = vld [vmem:[#allocation7 + $0x3a8] sm:$0xf]  ;;  %v2251_v16 = vld [vmem:[#allocation7 + $0x34] sm:$0xf0] }
 0x1ad   :  { %v410_v39 = vmul.f32 %v2396_v27, %v409_v33  ;;  %v2075_v33 = vor.u32 %v2339_v22, %v2074_v21  ;;  %v1898_v59 = vld [vmem:[#allocation7 + $0x188] sm:$0xf]  ;;  %v2287_v22 = vld [vmem:[#allocation7 + $0x154] sm:$0xf0] }
 0x1ae   :  { %v2400_v41 = vpop.eup %2399  ;;  %v455_v42 = vmul.f32 %v2398_v28, %v454_v36  ;;  %v1899_v4 = vor.u32 %v2295_v60, %v1898_v59  ;;  %v1882_v10 = vld [vmem:[#allocation7 + $0x168] sm:$0xf]  ;;  %v2337_v60 = vld [vmem:[#allocation7 + $0x2ec] sm:$0xf] }
 0x1af   :  { %v2402_v43 = vpop.eup %2401  ;;  %v411_v44 = vadd.f32 %v2396_v27, %v410_v39  ;;  %v423_v47 = vmul.f32 %v2400_v41, %v2598_v25  ;;  %vm428_vm11 = vweird.f32 %v2400_v41  ;;  %v2171_v39 = vor.u32 %v2363_v31, %v2170_v30  ;;  %v1866_v21 = vld [vmem:[#allocation7 + $0x148] sm:$0xf]  ;;  %v2343_v30 = vld [vmem:[#allocation7 + $0x314] sm:$0xf0] }
 0x1b0   :  { %v456_v48 = vadd.f32 %v2398_v28, %v455_v42  ;;  %v438_v51 = vmul.f32 %v2402_v43, %v2600_v26  ;;  %vm443_vm12 = vweird.f32 %v2402_v43  ;;  %vm429_vm14 = vmor %vm427_vm13, %vm428_vm11  ;;  %v1786_v26 = vld [vmem:[#allocation7 + $0xa8] sm:$0xf]  ;;  %v1867_v31 = vor.u32 %v2287_v22, %v1866_v21  ;;  %v2297_v21 = vld [vmem:[#allocation7 + $0x1ac] sm:$0xf] }
 0x1b1   :  { %v415_v52 = vsel %vm414_vm8, %v2396_v27, %v411_v44  ;;  %v424_v53 = vsub.f32 1.0, %v423_v47  ;;  %vm444_vm1 = vmor %vm442_vm15, %vm443_vm12  ;;  %v2267_v27 = vld [vmem:[#allocation7 + $0xb4] sm:$0xf0]  ;;  %v2154_v42 = vld [vmem:[#allocation7 + $0x388] sm:$0xf] }
 0x1b2   :  { %v420_v56 = vsel %vm417_vm7, %v419_v46, %v415_v52  ;;  %v460_v57 = vsel %vm459_vm10, %v2398_v28, %v456_v48  ;;  %v439_v58 = vsub.f32 1.0, %v438_v51  ;;  %v1787_v37 = vor.u32 %v2267_v27, %v1786_v26  ;;  %v1914_v46 = vld [vmem:[#allocation7 + $0x1a8] sm:$0xf]  ;;  %v2299_v47 = vld [vmem:[#allocation7 + $0x1b4] sm:$0xf0] }
 0x1b3   :  { %v467_v62 = vmul.f32 %v420_v56, %v2584_v45  ;;  %v465_v63 = vsel %vm462_vm9, %v464_v50, %v460_v57  ;;  %v425_v0 = vmul.f32 %v2400_v41, %v424_v53  ;;  %v434_v45 = vor.u32 1.1754944e-38, %v433_v55  ;;  %v2042_v50 = vld [vmem:[#allocation7 + $0x2a8] sm:$0xf]  ;;  %v2331_v51 = vld [vmem:[#allocation7 + $0x2b4] sm:$0xf0] }
 0x1b4   :  { %v470_v1 = vmul.f32 %v465_v63, %v2586_v49  ;;  %v440_v2 = vmul.f32 %v2402_v43, %v439_v58  ;;  %v2186_v49 = vld [vmem:[#allocation7 + $0x3c8] sm:$0xf]  ;;  %v1915_v55 = vor.u32 %v2299_v47, %v1914_v46  ;;  %v2355_v57 = vld [vmem:[#allocation7 + $0x374] sm:$0xf0]  ;;  %v2043_v58 = vor.u32 %v2331_v51, %v2042_v50  ;;  %v2365_v50 = vld [vmem:[#allocation7 + $0x3cc] sm:$0xf] }
 0x1b5   :  { %v2618_v5 = vpack.c.bf16 %v467_v62, %v467_v62  ;;  %v426_v7 = vadd.f32 %v2400_v41, %v425_v0  ;;  %v2187_v25 = vor.u32 %v2367_v13, %v2186_v49  ;;  %v1754_v53 = vld [vmem:[#allocation7 + $0x68] sm:$0xf]  ;;  %v2327_v63 = vld [vmem:[#allocation7 + $0x294] sm:$0xf0]  ;;  %v2188_v51 = vld [vmem:[#allocation7 + $0x3d8] sm:$0xf0] }
 0x1b6   :  { %v2621_v11 = vpack.c.bf16 %v470_v1, %v470_v1  ;;  %v441_v12 = vadd.f32 %v2402_v43, %v440_v2  ;;  %v2138_v56 = vld [vmem:[#allocation7 + $0x368] sm:$0xf]  ;;  %v1755_v61 = vor.u32 %v2259_v54, %v1754_v53  ;;  %v2255_v2 = vld [vmem:[#allocation7 + $0x54] sm:$0xf0]  ;;  %v1916_v22 = vld [vmem:[#allocation7 + $0x1b8] sm:$0xf0] }
 0x1b7   :  { %v430_v14 = vsel %vm429_vm14, %v2400_v41, %v426_v7  ;;  %1261 = vmatmul.bf16.vlgmr.msrb.gmra.mxu1 %v2618_v5  ;;  %v1931_v41 = vor.u32 %v2303_v35, %v1930_v34  ;;  %v2026_v62 = vld [vmem:[#allocation7 + $0x288] sm:$0xf]  ;;  %v2139_v0 = vor.u32 %v2355_v57, %v2138_v56  ;;  %v2323_v13 = vld [vmem:[#allocation7 + $0x274] sm:$0xf0]  ;;  %v1820_v34 = vld [vmem:[#allocation7 + $0xf8] sm:$0xf0] }
 0x1b8   :  { %v435_v18 = vsel %vm432_vm0, %v434_v45, %v430_v14  ;;  %v445_v19 = vsel %vm444_vm1, %v2402_v43, %v441_v12  ;;  %1300 = vmatmul.bf16.vlgmr.msra.gmra.mxu0 %v2621_v11  ;;  %1357 = vmatpush.bf16.msrb.mxu1 %v1819_v40  ;;  %v1770_v40 = vld [vmem:[#allocation7 + $0x88] sm:$0xf]  ;;  %v2359_v43 = vld [vmem:[#allocation7 + $0x394] sm:$0xf0]  ;;  %v2027_v9 = vor.u32 %v2327_v63, %v2026_v62  ;;  %v2369_v35 = vld [vmem:[#allocation7 + $0x3ec] sm:$0xf] }
 0x1b9   :  { %v468_v23 = vmul.f32 %v435_v18, %v2592_v3  ;;  %v450_v24 = vsel %vm447_vm2, %v449_v15, %v445_v19  ;;  %1396 = vmatpush.bf16.msra.mxu0 %v2203_v8  ;;  %v2058_v3 = vld [vmem:[#allocation7 + $0x2c8] sm:$0xf]  ;;  %v2155_v52 = vor.u32 %v2359_v43, %v2154_v42  ;;  %v2351_v8 = vld [vmem:[#allocation7 + $0x354] sm:$0xf0]  ;;  %v2305_v57 = vld [vmem:[#allocation7 + $0x1ec] sm:$0xf]  ;;  %v2191_v62 = vor.u32 %v2365_v50, %v2188_v51 }
 0x1ba   :  { %v469_v28 = vmul.f32 %v450_v24, %v2594_v6  ;;  %v2263_v6 = vld [vmem:[#allocation7 + $0x94] sm:$0xf0]  ;;  %v2059_v44 = vor.u32 %v2335_v38, %v2058_v3  ;;  %v1738_v1 = vld [vmem:[#allocation7 + $0x48] sm:$0xf]  ;;  %v2204_v3 = vld [vmem:[#allocation7 + $0x3f8] sm:$0xf0] }
 0x1bb   :  { %v2629_v32 = vpack.c.bf16 %v468_v23, %v468_v23  ;;  %v1771_v48 = vor.u32 %v2263_v6, %v1770_v40  ;;  %v2122_v7 = vld [vmem:[#allocation7 + $0x348] sm:$0xf]  ;;  %v2291_v45 = vld [vmem:[#allocation7 + $0x174] sm:$0xf0]  ;;  %v1739_v12 = vor.u32 %v2255_v2, %v1738_v1  ;;  %v2207_v46 = vor.u32 %v2369_v35, %v2204_v3  ;;  %v1788_v1 = vld [vmem:[#allocation7 + $0xb8] sm:$0xf0] }
 0x1bc   :  { %v2631_v36 = vpack.c.bf16 %v469_v28, %v469_v28  ;;  %1358 = vmatpush.bf16.msrb.mxu1 %v1803_v20  ;;  %v2010_v49 = vld [vmem:[#allocation7 + $0x268] sm:$0xf]  ;;  %v2123_v14 = vor.u32 %v2351_v8, %v2122_v7  ;;  %v1883_v17 = vor.u32 %v2291_v45, %v1882_v10  ;;  %v2347_v19 = vld [vmem:[#allocation7 + $0x334] sm:$0xf0]  ;;  %v2361_v7 = vld [vmem:[#allocation7 + $0x3ac] sm:$0xf] }
 0x1bd   :  { %1397 = vmatpush.bf16.msra.mxu0 %v2187_v25  ;;  %1274 = vmatmul.bf16.vlgmr.msrb.gmra.mxu2 %v2629_v32  ;;  %v1722_v15 = vld [vmem:[#allocation7 + $0x28] sm:$0xf]  ;;  %v2011_v20 = vor.u32 %v2323_v13, %v2010_v49  ;;  %v2319_v25 = vld [vmem:[#allocation7 + $0x254] sm:$0xf0]  ;;  %v2172_v8 = vld [vmem:[#allocation7 + $0x3b8] sm:$0xf0] }
 0x1be   :  { %1287 = vmatmul.bf16.vlgmr.msrb.gmra.mxu3 %v2631_v36  ;;  %1370 = vmatpush.bf16.msrb.mxu2 %v1947_v29  ;;  %v2106_v18 = vld [vmem:[#allocation7 + $0x328] sm:$0xf]  ;;  %v1723_v23 = vor.u32 %v2251_v16, %v1722_v15  ;;  %v2247_v28 = vld [vmem:[#allocation7 + $0x14] sm:$0xf0]  ;;  %v2301_v10 = vld [vmem:[#allocation7 + $0x1cc] sm:$0xf] }
 0x1bf   :  { %1383 = vmatpush.bf16.msrb.mxu3 %v2075_v33  ;;  %v1994_v24 = vld [vmem:[#allocation7 + $0x248] sm:$0xf]  ;;  %v2107_v27 = vor.u32 %v2347_v19, %v2106_v18  ;;  %v2273_v33 = vld [vmem:[#allocation7 + $0xec] sm:$0xf]  ;;  %v2279_v54 = vld [vmem:[#allocation7 + $0x114] sm:$0xf0] }
 0x1c0   :  { %1359 = vmatpush.bf16.msrb.mxu1 %v1787_v37  ;;  %v1706_v26 = vld [vmem:[#allocation7 + $0x8] sm:$0xf]  ;;  %v1995_v37 = vor.u32 %v2319_v25, %v1994_v24  ;;  %v1823_v43 = vor.u32 %v2273_v33, %v1820_v34  ;;  %v2311_v56 = vld [vmem:[#allocation7 + $0x214] sm:$0xf0]  ;;  %v1932_v45 = vld [vmem:[#allocation7 + $0x1d8] sm:$0xf0] }
 0x1c1   :  { %1398 = vmatpush.bf16.msra.mxu0 %v2171_v39  ;;  %v2090_v29 = vld [vmem:[#allocation7 + $0x308] sm:$0xf]  ;;  %v2283_v39 = vld [vmem:[#allocation7 + $0x134] sm:$0xf0]  ;;  %v1707_v40 = vor.u32 %v2247_v28, %v1706_v26  ;;  %v2333_v49 = vld [vmem:[#allocation7 + $0x2cc] sm:$0xf] }
 0x1c2   :  { %1371 = vmatpush.bf16.msrb.mxu2 %v1931_v41  ;;  %v1850_v38 = vld [vmem:[#allocation7 + $0x128] sm:$0xf]  ;;  %v2315_v41 = vld [vmem:[#allocation7 + $0x234] sm:$0xf0]  ;;  %v2091_v42 = vor.u32 %v2343_v30, %v2090_v29  ;;  %v2060_v13 = vld [vmem:[#allocation7 + $0x2d8] sm:$0xf0]  ;;  %v1919_v29 = vor.u32 %v2297_v21, %v1916_v22 }
 0x1c3   :  { %1384 = vmatpush.bf16.msrb.mxu3 %v2059_v44  ;;  %v1978_v6 = vld [vmem:[#allocation7 + $0x228] sm:$0xf]  ;;  %v2269_v44 = vld [vmem:[#allocation7 + $0xcc] sm:$0xf]  ;;  %v1851_v47 = vor.u32 %v2283_v39, %v1850_v38  ;;  %v1772_v16 = vld [vmem:[#allocation7 + $0x98] sm:$0xf0] }
 0x1c4   :  { %1360 = vmatpush.bf16.msrb.mxu1 %v1771_v48  ;;  %v1804_v48 = vld [vmem:[#allocation7 + $0xd8] sm:$0xf0]  ;;  %v1834_v53 = vld [vmem:[#allocation7 + $0x108] sm:$0xf]  ;;  %v2261_v15 = vld [vmem:[#allocation7 + $0x8c] sm:$0xf] }
 0x1c5   :  { %1399 = vmatpush.bf16.msra.mxu0 %v2155_v52  ;;  %v1979_v52 = vor.u32 %v2315_v41, %v1978_v6  ;;  %v1807_v59 = vor.u32 %v2269_v44, %v1804_v48  ;;  %v1835_v63 = vor.u32 %v2279_v54, %v1834_v53  ;;  %v2357_v18 = vld [vmem:[#allocation7 + $0x38c] sm:$0xf]  ;;  %v2156_v19 = vld [vmem:[#allocation7 + $0x398] sm:$0xf0] }
 0x1c6   :  { %1372 = vmatpush.bf16.msrb.mxu2 %v1915_v55  ;;  %v1962_v55 = vld [vmem:[#allocation7 + $0x208] sm:$0xf]  ;;  %v2329_v24 = vld [vmem:[#allocation7 + $0x2ac] sm:$0xf]  ;;  %v2044_v25 = vld [vmem:[#allocation7 + $0x2b8] sm:$0xf0]  ;;  %v2159_v26 = vor.u32 %v2357_v18, %v2156_v19 }
 0x1c7   :  { %1385 = vmatpush.bf16.msrb.mxu3 %v2043_v58  ;;  %1313 = vmatmul.bf16.vlgmr.msra.gmra.mxu1 %v2618_v5  ;;  %v1948_v58 = vld [vmem:[#allocation7 + $0x1f8] sm:$0xf0]  ;;  %v1963_v2 = vor.u32 %v2311_v56, %v1962_v55  ;;  %v2353_v30 = vld [vmem:[#allocation7 + $0x36c] sm:$0xf]  ;;  %v2047_v33 = vor.u32 %v2329_v24, %v2044_v25  ;;  %v2650_v25 = vld [vmem:[%s2664_s5] sm:$0xf] }
 0x1c8   :  { %1352 = vmatmul.bf16.vlgmr.msrb.gmra.mxu0 %v2621_v11  ;;  %1361 = vmatpush.bf16.msrb.mxu1 %v1755_v61  ;;  %v2076_v61 = vld [vmem:[#allocation7 + $0x2f8] sm:$0xf0]  ;;  %v2293_v34 = vld [vmem:[#allocation7 + $0x18c] sm:$0xf]  ;;  %s2529_s5 = smov [#allocation8]  }
 0x1c9   :  { %1400 = vmatpush.bf16.msra.mxu0 %v2139_v0  ;;  %v2265_v0 = vld [vmem:[#allocation7 + $0xac] sm:$0xf]  ;;  %v1756_v28 = vld [vmem:[#allocation7 + $0x78] sm:$0xf0]  ;;  %s1550_s17 = sshll.u32 %s2529_s5, 4  ;;  %s1551_s17 = int_to_ptr.vmem [resolvable:$true] %s1550_s17 }
 0x1ca   :  { %1373 = vmatpush.bf16.msrb.mxu2 %v1899_v4  ;;  %v1951_v4 = vor.u32 %v2305_v57, %v1948_v58  ;;  %v1900_v35 = vld [vmem:[#allocation7 + $0x198] sm:$0xf0]  ;;  %v2325_v3 = vld [vmem:[#allocation7 + $0x28c] sm:$0xf] }
 0x1cb   :  { %1386 = vmatpush.bf16.msrb.mxu3 %v2027_v9  ;;  %v2079_v9 = vor.u32 %v2337_v60, %v2076_v61  ;;  %v2028_v38 = vld [vmem:[#allocation7 + $0x298] sm:$0xf0]  ;;  %v1903_v41 = vor.u32 %v2293_v34, %v1900_v35  ;;  %v2321_v50 = vld [vmem:[#allocation7 + $0x26c] sm:$0xf] }
 0x1cc   :  { %1362 = vmatpush.bf16.msrb.mxu1 %v1739_v12  ;;  %v1791_v12 = vor.u32 %v2265_v0, %v1788_v1  ;;  %v1740_v6 = vld [vmem:[#allocation7 + $0x58] sm:$0xf0]  ;;  %v2031_v44 = vor.u32 %v2325_v3, %v2028_v38  ;;  %v2249_v53 = vld [vmem:[#allocation7 + $0x2c] sm:$0xf]  ;;  %v606_v3 = vperm.slane %v2650_v25, 1 }
 0x1cd   :  { %1401 = vmatpush.bf16.msra.mxu0 %v2123_v14  ;;  %1326 = vmatmul.bf16.vlgmr.msra.gmra.mxu2 %v2629_v32  ;;  %v2175_v14 = vor.u32 %v2361_v7, %v2172_v8  ;;  %v2012_v51 = vld [vmem:[#allocation7 + $0x278] sm:$0xf0]  ;;  %v2345_v56 = vld [vmem:[#allocation7 + $0x32c] sm:$0xf] }
 0x1ce   :  { %1339 = vmatmul.bf16.vlgmr.msra.gmra.mxu3 %v2631_v36  ;;  %1374 = vmatpush.bf16.msrb.mxu2 %v1883_v17  ;;  %v1935_v17 = vor.u32 %v2301_v10, %v1932_v45  ;;  %v1724_v54 = vld [vmem:[#allocation7 + $0x38] sm:$0xf0]  ;;  %v2015_v58 = vor.u32 %v2321_v50, %v2012_v51  ;;  %v2245_v1 = vld [vmem:[#allocation7 + $0xc] sm:$0xf] }
 0x1cf   :  { %1387 = vmatpush.bf16.msrb.mxu3 %v2011_v20  ;;  %v2063_v20 = vor.u32 %v2333_v49, %v2060_v13  ;;  %v2108_v57 = vld [vmem:[#allocation7 + $0x338] sm:$0xf0]  ;;  %v1727_v61 = vor.u32 %v2249_v53, %v1724_v54  ;;  %v2341_v7 = vld [vmem:[#allocation7 + $0x30c] sm:$0xf] }
 0x1d0   :  { %1363 = vmatpush.bf16.msrb.mxu1 %v1723_v23  ;;  %v1775_v23 = vor.u32 %v2261_v15, %v1772_v16  ;;  %v1868_v60 = vld [vmem:[#allocation7 + $0x158] sm:$0xf0]  ;;  %v2111_v0 = vor.u32 %v2345_v56, %v2108_v57  ;;  %v2281_v10 = vld [vmem:[#allocation7 + $0x12c] sm:$0xf]  ;;  %v607_v57 = vperm.slane %v2650_v25, 2 }
 0x1d1   :  { %1402 = vmatpush.bf16.msra.mxu0 %v2107_v27  ;;  %v2257_v27 = vld [vmem:[#allocation7 + $0x6c] sm:$0xf]  ;;  %v2092_v8 = vld [vmem:[#allocation7 + $0x318] sm:$0xf0] }
 0x1d2   :  { %1375 = vmatpush.bf16.msrb.mxu2 %v1867_v31  ;;  %v2140_v31 = vld [vmem:[#allocation7 + $0x378] sm:$0xf0]  ;;  %v2313_v49 = vld [vmem:[#allocation7 + $0x22c] sm:$0xf] }
 0x1d3   :  { %1388 = vmatpush.bf16.msrb.mxu3 %v1995_v37  ;;  %v1759_v37 = vor.u32 %v2257_v27, %v1756_v28  ;;  %v2143_v39 = vor.u32 %v2353_v30, %v2140_v31  ;;  %v1852_v45 = vld [vmem:[#allocation7 + $0x138] sm:$0xf0]  ;;  %v2309_v19 = vld [vmem:[#allocation7 + $0x20c] sm:$0xf] }
 0x1d4   :  { %1364 = vmatpush.bf16.msrb.mxu1 %v1707_v40  ;;  %v2253_v40 = vld [vmem:[#allocation7 + $0x4c] sm:$0xf]  ;;  %v1980_v13 = vld [vmem:[#allocation7 + $0x238] sm:$0xf0]  ;;  %v1855_v15 = vor.u32 %v2281_v10, %v1852_v45 }
 0x1d5   :  { %1403 = vmatpush.bf16.msra.mxu0 %v2091_v42  ;;  %v2349_v42 = vld [vmem:[#allocation7 + $0x34c] sm:$0xf]  ;;  %v1743_v48 = vor.u32 %v2253_v40, %v1740_v6  ;;  %v1983_v16 = vor.u32 %v2313_v49, %v1980_v13  ;;  %v1836_v18 = vld [vmem:[#allocation7 + $0x118] sm:$0xf0] }
 0x1d6   :  { %1376 = vmatpush.bf16.msrb.mxu2 %v1851_v47  ;;  %v1884_v47 = vld [vmem:[#allocation7 + $0x178] sm:$0xf0] }
 0x1d7   :  { %1389 = vmatpush.bf16.msrb.mxu3 %v1979_v52  ;;  %1365 = vmatmul.bf16.vlgmr.msrb.gmra.mxu1 %v2618_v5 }
 0x1d8   :  { %1409 = vmatpush.bf16.msra.mxu1 %v1823_v43  ;;  %1404 = vmatmul.bf16.vlgmr.msra.gmra.mxu0 %v2621_v11  ;;  %v2124_v43 = vld [vmem:[#allocation7 + $0x358] sm:$0xf0] }
 0x1d9   :  { %1448 = vmatpush.bf16.msrb.mxu0 %v2207_v46  ;;  %v2289_v46 = vld [vmem:[#allocation7 + $0x16c] sm:$0xf]  ;;  %v2127_v52 = vor.u32 %v2349_v42, %v2124_v43 }
 0x1da   :  { %1377 = vmatpush.bf16.msrb.mxu2 %v1835_v63  ;;  %v1887_v55 = vor.u32 %v2289_v46, %v1884_v47  ;;  %v1996_v63 = vld [vmem:[#allocation7 + $0x258] sm:$0xf0] }
 0x1db   :  { %1390 = vmatpush.bf16.msrb.mxu3 %v1963_v2  ;;  %v1708_v2 = vld [vmem:[#allocation7 + $0x18] sm:$0xf0] }
 0x1dc   :  { %1410 = vmatpush.bf16.msra.mxu1 %v1807_v59  ;;  %v2285_v59 = vld [vmem:[#allocation7 + $0x14c] sm:$0xf] }
 0x1dd   :  { %1449 = vmatpush.bf16.msrb.mxu0 %v2191_v62  ;;  %1378 = vmatmul.bf16.vlgmr.msrb.gmra.mxu2 %v2629_v32  ;;  %v2317_v62 = vld [vmem:[#allocation7 + $0x24c] sm:$0xf] }
 0x1de   :  { %1422 = vmatpush.bf16.msra.mxu2 %v1951_v4  ;;  %1391 = vmatmul.bf16.vlgmr.msrb.gmra.mxu3 %v2631_v36  ;;  %v1871_v4 = vor.u32 %v2285_v59, %v1868_v60 }
 0x1df   :  { %1435 = vmatpush.bf16.msra.mxu3 %v2079_v9  ;;  %v1999_v9 = vor.u32 %v2317_v62, %v1996_v63 }
 0x1e0   :  { %1411 = vmatpush.bf16.msra.mxu1 %v1791_v12  ;;  %v1711_v12 = vor.u32 %v2245_v1, %v1708_v2 }
 0x1e1   :  { %1450 = vmatpush.bf16.msrb.mxu0 %v2175_v14  ;;  %v2095_v14 = vor.u32 %v2341_v7, %v2092_v8 }
 0x1e2   :  { %1423 = vmatpush.bf16.msra.mxu2 %v1935_v17  ;;  %v2277_v17 = vld [vmem:[#allocation7 + $0x10c] sm:$0xf] }
 0x1e3   :  { %1436 = vmatpush.bf16.msra.mxu3 %v2063_v20  ;;  %v1964_v20 = vld [vmem:[#allocation7 + $0x218] sm:$0xf0]  ;;  %v1839_v21 = vor.u32 %v2277_v17, %v1836_v18 }
 0x1e4   :  { %1412 = vmatpush.bf16.msra.mxu1 %v1775_v23  ;;  %v1967_v22 = vor.u32 %v2309_v19, %v1964_v20 }
 0x1e5   :  { %1451 = vmatpush.bf16.msrb.mxu0 %v2159_v26  ;;  %v605_v26 = vperm.slane %v2650_v25, 0 }
 0x1e6   :  { %1424 = vmatpush.bf16.msra.mxu2 %v1919_v29 }
 0x1e7   :  { %1437 = vmatpush.bf16.msra.mxu3 %v2047_v33 }
 0x1e8   :  { %1413 = vmatpush.bf16.msra.mxu1 %v1759_v37 }
 0x1e9   :  { %1452 = vmatpush.bf16.msrb.mxu0 %v2143_v39 }
 0x1ea   :  { %1425 = vmatpush.bf16.msra.mxu2 %v1903_v41 }
 0x1eb   :  { %1438 = vmatpush.bf16.msra.mxu3 %v2031_v44 }
 0x1ec   :  { %1414 = vmatpush.bf16.msra.mxu1 %v1743_v48 }
 0x1ed   :  { %1453 = vmatpush.bf16.msrb.mxu0 %v2127_v52 }
 0x1ee   :  { %1426 = vmatpush.bf16.msra.mxu2 %v1887_v55 }
 0x1ef   :  { %1439 = vmatpush.bf16.msra.mxu3 %v2015_v58 }
 0x1f0   :  { %1415 = vmatpush.bf16.msra.mxu1 %v1727_v61 }
 0x1f1   :  { %1454 = vmatpush.bf16.msrb.mxu0 %v2111_v0 }
 0x1f2   :  { %1427 = vmatpush.bf16.msra.mxu2 %v1871_v4 }
 0x1f3   :  { %1440 = vmatpush.bf16.msra.mxu3 %v1999_v9 }
 0x1f4   :  { %1416 = vmatpush.bf16.msra.mxu1 %v1711_v12 }
 0x1f5   :  { %1455 = vmatpush.bf16.msrb.mxu0 %v2095_v14 }
 0x1f6   :  { %1428 = vmatpush.bf16.msra.mxu2 %v1855_v15 }
 0x1f7   :  { %1441 = vmatpush.bf16.msra.mxu3 %v1983_v16  ;;  %1417 = vmatmul.bf16.vlgmr.msra.gmra.mxu1 %v2618_v5 }
 0x1f8   :  { %1456 = vmatmul.bf16.vlgmr.msrb.gmra.mxu0 %v2621_v11 }
 0x1fa   :  { %1429 = vmatpush.bf16.msra.mxu2 %v1839_v21 }
 0x1fb   :  { %1442 = vmatpush.bf16.msra.mxu3 %v1967_v22 }
 0x1fd   :  { %1430 = vmatmul.bf16.vlgmr.msra.gmra.mxu2 %v2629_v32 }
 0x1fe   :  { %1443 = vmatmul.bf16.vlgmr.msra.gmra.mxu3 %v2631_v36 }
 0x234   :  { %v1262_v23 = vpop.f32.mrf.mxu1 }
 0x235   :  { %v1301_v24 = vpop.f32.mrf.mxu0  ;;  %v1263_v28 = vadd.f32 %v1262_v23, %v605_v26 }
 0x23c   :  { %v1264_v27 = vpop.f32.mrf.mxu1 }
 0x23d   :  { %v1303_v5 = vpop.f32.mrf.mxu0 }
 0x240   :  { %v1275_v29 = vpop.f32.mrf.mxu2 }
 0x241   :  { %v1276_v11 = vadd.f32 %v1275_v29, %v1263_v28  ;;  %v1288_v30 = vpop.f32.mrf.mxu3 }
 0x243   :  { %v1289_v31 = vadd.f32 %v1288_v30, %v1276_v11 }
 0x244   :  { %v1314_v33 = vpop.f32.mrf.mxu1 }
 0x245   :  { %v1302_v32 = vadd.f32 %v1301_v24, %v1289_v31  ;;  %v1353_v34 = vpop.f32.mrf.mxu0  ;;  %v1315_v6 = vadd.f32 %v1314_v33, %v606_v3  ;;  %v608_v33 = vperm.slane %v2650_v25, 3 }
 0x247   :  { %v2208_v36 = vmul.f32 -1.442695, %v1302_v32 }
 0x248   :  { %v1277_v35 = vpop.f32.mrf.mxu2 }
 0x249   :  { %2403 = vpow2.f32 %v2208_v36  ;;  %v1290_v37 = vpop.f32.mrf.mxu3 }
 0x24c   :  { %v1316_v38 = vpop.f32.mrf.mxu1 }
 0x24d   :  { %v1355_v39 = vpop.f32.mrf.mxu0 }
 0x24f   :  { %v2404_v40 = vpop.eup %2403 }
 0x250   :  { %v1473_v41 = vadd.f32 1.0, %v2404_v40  ;;  %v1327_v42 = vpop.f32.mrf.mxu2 }
 0x251   :  { %v1328_v43 = vadd.f32 %v1327_v42, %v1315_v6  ;;  %v1340_v44 = vpop.f32.mrf.mxu3 }
 0x252   :  { %2405 = vrcp.f32 %v1473_v41  ;;  %v1488_v58 = vand.u32 2147483648, %v1473_v41  ;;  %v1486_v61 = vand.u32 2147483647, %v1473_v41  ;;  %vm1482_vm4 = vweird.f32 %v1473_v41 }
 0x253   :  { %v1341_v46 = vadd.f32 %v1340_v44, %v1328_v43 }
 0x254   :  { %v1366_v47 = vpop.f32.mrf.mxu1  ;;  %v1489_v2 = vor.u32 1.1754944e-38, %v1488_v58  ;;  %vm1487_vm6 = vcmp.eq.f32.partialorder %v1486_v61, 8.507059e+37 }
 0x255   :  { %v1354_v48 = vadd.f32 %v1353_v34, %v1341_v46  ;;  %v1405_v50 = vpop.f32.mrf.mxu0  ;;  %v1367_v1 = vadd.f32 %v1366_v47, %v607_v57 }
 0x257   :  { %v2209_v51 = vmul.f32 -1.442695, %v1354_v48 }
 0x258   :  { %v2406_v52 = vpop.eup %2405  ;;  %v1329_v53 = vpop.f32.mrf.mxu2 }
 0x259   :  { %v1478_v54 = vmul.f32 %v2406_v52, %v1473_v41  ;;  %2407 = vpow2.f32 %v2209_v51  ;;  %v1342_v55 = vpop.f32.mrf.mxu3  ;;  %vm1483_vm3 = vweird.f32 %v2406_v52 }
 0x25a   :  { %vm1484_vm5 = vmor %vm1482_vm4, %vm1483_vm3 }
 0x25b   :  { %v1479_v56 = vsub.f32 1.0, %v1478_v54 }
 0x25c   :  { %v1368_v59 = vpop.f32.mrf.mxu1 }
 0x25d   :  { %v1480_v60 = vmul.f32 %v2406_v52, %v1479_v56  ;;  %v1407_v62 = vpop.f32.mrf.mxu0 }
 0x25f   :  { %v2408_v63 = vpop.eup %2407  ;;  %v1481_v0 = vadd.f32 %v2406_v52, %v1480_v60 }
 0x260   :  { %v1474_v4 = vadd.f32 1.0, %v2408_v63  ;;  %v1379_v7 = vpop.f32.mrf.mxu2 }
 0x261   :  { %v1485_v8 = vsel %vm1484_vm5, %v2406_v52, %v1481_v0  ;;  %v1380_v9 = vadd.f32 %v1379_v7, %v1367_v1  ;;  %v1392_v10 = vpop.f32.mrf.mxu3 }
 0x262   :  { %v1490_v45 = vsel %vm1487_vm6, %v1489_v2, %v1485_v8  ;;  %2409 = vrcp.f32 %v1474_v4  ;;  %v1503_v20 = vand.u32 2147483648, %v1474_v4  ;;  %v1501_v22 = vand.u32 2147483647, %v1474_v4 }
 0x263   :  { %v1537_v12 = vmul.f32 %v1490_v45, %v1302_v32  ;;  %v1393_v49 = vadd.f32 %v1392_v10, %v1380_v9  ;;  %vm1497_vm8 = vweird.f32 %v1474_v4 }
 0x264   :  { %v1504_v26 = vor.u32 1.1754944e-38, %v1503_v20  ;;  %vm1502_vm10 = vcmp.eq.f32.partialorder %v1501_v22, 8.507059e+37 }
 0x265   :  { %1541 = vst [vmem:[#allocation8] sm:$0xff] %v1537_v12  ;;  %v1406_v13 = vadd.f32 %v1405_v50, %v1393_v49 }
 0x267   :  { %v2210_v14 = vmul.f32 -1.442695, %v1406_v13 }
 0x268   :  { %v2410_v15 = vpop.eup %2409  ;;  %v1381_v16 = vpop.f32.mrf.mxu2 }
 0x269   :  { %v1493_v17 = vmul.f32 %v2410_v15, %v1474_v4  ;;  %2411 = vpow2.f32 %v2210_v14  ;;  %v1394_v18 = vpop.f32.mrf.mxu3  ;;  %vm1498_vm7 = vweird.f32 %v2410_v15 }
 0x26a   :  { %vm1499_vm9 = vmor %vm1497_vm8, %vm1498_vm7 }
 0x26b   :  { %v1494_v19 = vsub.f32 1.0, %v1493_v17 }
 0x26d   :  { %v1495_v21 = vmul.f32 %v2410_v15, %v1494_v19 }
 0x26f   :  { %v2412_v23 = vpop.eup %2411  ;;  %v1496_v24 = vadd.f32 %v2410_v15, %v1495_v21 }
 0x270   :  { %v1475_v27 = vadd.f32 1.0, %v2412_v23 }
 0x271   :  { %v1500_v5 = vsel %vm1499_vm9, %v2410_v15, %v1496_v24 }
 0x272   :  { %v1505_v29 = vsel %vm1502_vm10, %v1504_v26, %v1500_v5  ;;  %2413 = vrcp.f32 %v1475_v27  ;;  %v1518_v37 = vand.u32 2147483648, %v1475_v27  ;;  %v1516_v39 = vand.u32 2147483647, %v1475_v27 }
 0x273   :  { %v1538_v30 = vmul.f32 %v1505_v29, %v1354_v48  ;;  %vm1512_vm12 = vweird.f32 %v1475_v27 }
 0x274   :  { %v1418_v28 = vpop.f32.mrf.mxu1  ;;  %v1519_v43 = vor.u32 1.1754944e-38, %v1518_v37  ;;  %vm1517_vm14 = vcmp.eq.f32.partialorder %v1516_v39, 8.507059e+37 }
 0x275   :  { %v1457_v11 = vpop.f32.mrf.mxu0  ;;  %1542 = vst [vmem:[#allocation8 + $0x8] sm:$0xff] %v1538_v30  ;;  %v1419_v3 = vadd.f32 %v1418_v28, %v608_v33 }
 0x278   :  { %v2414_v31 = vpop.eup %2413 }
 0x279   :  { %v1508_v32 = vmul.f32 %v2414_v31, %v1475_v27  ;;  %vm1513_vm11 = vweird.f32 %v2414_v31 }
 0x27a   :  { %vm1514_vm13 = vmor %vm1512_vm12, %vm1513_vm11 }
 0x27b   :  { %v1509_v35 = vsub.f32 1.0, %v1508_v32 }
 0x27c   :  { %v1420_v34 = vpop.f32.mrf.mxu1 }
 0x27d   :  { %v1459_v36 = vpop.f32.mrf.mxu0  ;;  %v1510_v38 = vmul.f32 %v2414_v31, %v1509_v35 }
 0x27f   :  { %v1511_v42 = vadd.f32 %v2414_v31, %v1510_v38 }
 0x280   :  { %v1431_v40 = vpop.f32.mrf.mxu2 }
 0x281   :  { %v1432_v6 = vadd.f32 %v1431_v40, %v1419_v3  ;;  %v1444_v41 = vpop.f32.mrf.mxu3  ;;  %v1515_v46 = vsel %vm1514_vm13, %v2414_v31, %v1511_v42 }
 0x282   :  { %v1520_v25 = vsel %vm1517_vm14, %v1519_v43, %v1515_v46 }
 0x283   :  { %v1445_v44 = vadd.f32 %v1444_v41, %v1432_v6  ;;  %v1539_v48 = vmul.f32 %v1520_v25, %v1406_v13 }
 0x285   :  { %v1458_v47 = vadd.f32 %v1457_v11, %v1445_v44  ;;  %1543 = vst [vmem:[#allocation8 + $0x10] sm:$0xff] %v1539_v48 }
 0x287   :  { %v2211_v50 = vmul.f32 -1.442695, %v1458_v47 }
 0x288   :  { %v1433_v51 = vpop.f32.mrf.mxu2 }
 0x289   :  { %2415 = vpow2.f32 %v2211_v50  ;;  %v1446_v52 = vpop.f32.mrf.mxu3 }
 0x28f   :  { %v2416_v53 = vpop.eup %2415 }
 0x290   :  { %v1476_v54 = vadd.f32 1.0, %v2416_v53 }
 0x292   :  { %2417 = vrcp.f32 %v1476_v54  ;;  %v1533_v58 = vand.u32 2147483648, %v1476_v54  ;;  %v1531_v60 = vand.u32 2147483647, %v1476_v54  ;;  %vm1527_vm0 = vweird.f32 %v1476_v54 }
 0x294   :  { %v1534_v62 = vor.u32 1.1754944e-38, %v1533_v58  ;;  %vm1532_vm2 = vcmp.eq.f32.partialorder %v1531_v60, 8.507059e+37 }
 0x298   :  { %v2418_v55 = vpop.eup %2417 }
 0x299   :  { %v1523_v56 = vmul.f32 %v2418_v55, %v1476_v54  ;;  %vm1528_vm15 = vweird.f32 %v2418_v55 }
 0x29a   :  { %vm1529_vm1 = vmor %vm1527_vm0, %vm1528_vm15 }
 0x29b   :  { %v1524_v57 = vsub.f32 1.0, %v1523_v56 }
 0x29d   :  { %v1525_v59 = vmul.f32 %v2418_v55, %v1524_v57 }
 0x29f   :  { %v1526_v61 = vadd.f32 %v2418_v55, %v1525_v59 }
 0x2a1   :  { %v1530_v63 = vsel %vm1529_vm1, %v2418_v55, %v1526_v61 }
 0x2a2   :  { %v1535_v0 = vsel %vm1532_vm2, %v1534_v62, %v1530_v63 }
 0x2a3   :  { %v1540_v1 = vmul.f32 %v1535_v0, %v1458_v47 }
 0x2a5   :  { %1544 = vst [vmem:[#allocation8 + $0x18] sm:$0xff] %v1540_v1 }
 0x2a6   :  { %1555 = dma.vmem_to_hbm [thread:$0]  %s1551_s17, 512, %s1553_s20, [#allocation4]  }
 0x2a7   :  { %2519 = dma.done.wait [#allocation4], 512  }
 0x2a8   :  { %2520 = vsyncadd [#allocation4], 4294966784 }
 0x2a9   :  { %1560 = vsyncpa [#allocation3], 1 }
 0x2aa   :  { %1561 = vsyncpa [#allocation6], 1 }
 0x2ab   :  { %1562 = vsyncpa [#allocation4], 1 }

</bundles_post_ra>
